<compile_context>
chip_gen: v7x
topology: tpu7x:2x2x1
jax: 0.10.0
libtpu: 0.0.40
codegen_flags: <defaults>
</compile_context>

<pallas_src>
import math

import jax
import jax.numpy as jnp
import numpy as np
from jax import lax
from jax.experimental import pallas as pl
from jax.experimental.pallas import tpu as pltpu

_NEG = -10000.0
_TINY = 1e-37  # clamp for the shifted sums; keeps log() finite (no -inf/NaN)


def _round_up(x, m):
    return (x + m - 1) // m * m


def _lse(x, axis):
    # Matches the PyTorch log_sum_exp: max + log(sum(exp(x - max)))
    m = jnp.max(x, axis=axis)
    return m + jnp.log(jnp.sum(jnp.exp(x - jnp.expand_dims(m, axis)), axis=axis))


def make_crf_forward_kernel(start_idx, stop_idx, n_labels, t_chunk):
    L = n_labels
    T = t_chunk

    def kernel(sched_ref,     # SMEM (2,)  int32   [max_len, last_active_chunk]
               logits_ref,    # VMEM (TB, T*L)     logits chunk, native (b,(t,l))
               length_ref,    # VMEM (1, TB) int32
               trans_ref,     # VMEM (L, L)  f32   trans[i, j] = j -> i
               norm_ref,      # VMEM (1, TB) f32   output
               alpha_scr,     # VMEM (L, TB) f32   forward variables
               tm_scr,        # VMEM (L, 1)  f32   per-row max of trans
               expsh_scr,     # VMEM (L, L)  f32   exp(trans - rowmax)
               lt_scr):       # VMEM (T*L, TB) f32 transposed logits chunk
        c = pl.program_id(1)
        n_c = pl.num_programs(1)
        TB = alpha_scr.shape[1]
        max_len = sched_ref[0]

        @pl.when(c == 0)
        def _init():
            row = lax.broadcasted_iota(jnp.int32, (L, TB), 0)
            alpha_scr[...] = jnp.where(row == start_idx,
                                       jnp.float32(0.0), jnp.float32(_NEG))
            trans = trans_ref[...]
            tm = jnp.max(trans, axis=1, keepdims=True)      # [L, 1]
            tm_scr[...] = tm
            expsh_scr[...] = jnp.exp(trans - tm)            # <= 1, no overflow

        # Skip all work for chunks entirely past the longest sequence.
        @pl.when(c * T < max_len)
        def _chunk():
            # One in-kernel relayout per chunk: [TB, T*L] -> [T*L, TB].
            lt_scr[...] = jnp.transpose(logits_ref[...].astype(jnp.float32),
                                        (1, 0))
            expsh = expsh_scr[...]                           # [L, L]
            tmb = jnp.broadcast_to(tm_scr[...], (L, TB))     # hoisted broadcast
            length = length_ref[...]                         # [1, TB]
            t0 = c * T

            # TODO(synk): carry alpha in (per-column scale, linear) form to
            # halve per-step EUP transcendental traffic once profiled.
            def step(s, alpha):
                off = pl.multiple_of(s * L, L)
                logit = lt_scr[pl.ds(off, L), :]             # [L, TB]
                m = jnp.max(alpha, axis=0, keepdims=True)    # [1, TB]
                e = jnp.exp(alpha - m)                       # <= 1
                # s[i,b] = sum_j exp(trans[i,j]-tm[i]) * exp(alpha[j,b]-m[b])
                ssum = jnp.dot(expsh, e,
                               preferred_element_type=jnp.float32)
                ssum = jnp.maximum(ssum, jnp.float32(_TINY))
                # logit is constant over the reduced axis j -> added after LSE
                alpha_nxt = logit + m + tmb + jnp.log(ssum)
                keep = length > (t0 + s)                     # [1, TB]
                return jnp.where(keep, alpha_nxt, alpha)

            alpha_scr[...] = lax.fori_loop(0, T, step, alpha_scr[...],
                                           unroll=True)

        @pl.when(c == n_c - 1)
        def _final():
            alpha = alpha_scr[...]
            # norm[b] = LSE_i(alpha[i,b] + trans[stop_idx, i]); reuse the
            # precomputed exp(trans - rowmax) row to stay transpose-free.
            stop_e = expsh_scr[stop_idx:stop_idx + 1, :]     # [1, L]
            sm = tm_scr[stop_idx:stop_idx + 1, :]            # [1, 1]
            m2 = jnp.max(alpha, axis=0, keepdims=True)       # [1, TB]
            z = jnp.dot(stop_e, jnp.exp(alpha - m2),
                        preferred_element_type=jnp.float32)  # [1, TB]
            z = jnp.maximum(z, jnp.float32(_TINY))
            norm_ref[...] = m2 + sm + jnp.log(z)

    return kernel


def crf_forward(logits, length, transitions, start_idx, stop_idx):
    """logits: [B, S, L], length: [B] int, transitions: [L, L] -> norm [B] f32."""
    B, S, L = logits.shape

    # Time chunk so that (t_chunk * L) is a multiple of 128 (lane-dense block
    # straight out of the native [B, S, L] layout).  L=8 -> t_chunk=16.
    base = 128 // math.gcd(L, 128)
    t_chunk = base * max(1, 16 // base)

    # Batch tiling: batch rides the 128-lane axis in-kernel.  Always pad to a
    # multiple of 128; prefer >= 2 tiles so the "parallel" axis can shard over
    # both TensorCores on v7x.  VMEM use is tiny, so tiles can be large.
    B128 = _round_up(B, 128)
    TB = min(1024, B128)
    if B128 >= 256:
        TB = min(TB, max(128, (B128 // 2) // 128 * 128))
    B_pad = _round_up(B128, TB)
    nb = B_pad // TB

    S_pad = _round_up(S, t_chunk)
    n_chunks = S_pad // t_chunk

    # Keep bf16 logits as-is (upcast in-kernel); anything else goes to f32.
    if logits.dtype not in (jnp.float32, jnp.bfloat16):
        logits = logits.astype(jnp.float32)
    if (B_pad != B) or (S_pad != S):
        logits = jnp.pad(logits, ((0, B_pad - B), (0, S_pad - S), (0, 0)))
    if B_pad != B:
        length = jnp.pad(length, (0, B_pad - B))     # length 0 -> fully masked

    # Contiguous-dim merge (free, no HBM pass): [B_pad, S_pad, L] -> [B_pad, S_pad*L]
    logits2d = logits.reshape(B_pad, S_pad * L)
    length = length.astype(jnp.int32)
    length2d = length.reshape(1, B_pad)

    max_len = jnp.max(length).astype(jnp.int32)
    last_chunk = jnp.maximum((max_len + t_chunk - 1) // t_chunk - 1, 0)
    sched = jnp.stack([max_len, last_chunk]).astype(jnp.int32)   # SMEM prefetch

    kernel = make_crf_forward_kernel(start_idx, stop_idx, L, t_chunk)
    grid_spec = pltpu.PrefetchScalarGridSpec(
        num_scalar_prefetch=1,
        grid=(nb, n_chunks),
        in_specs=[
            # Clamp the chunk index past max_len: repeated block index ->
            # Pallas elides the DMA for fully-masked chunks.
            pl.BlockSpec((TB, t_chunk * L),
                         lambda b, c, sc: (b, jnp.minimum(c, sc[1]))),
            pl.BlockSpec((1, TB), lambda b, c, sc: (0, b)),          # length
            pl.BlockSpec((L, L), lambda b, c, sc: (0, 0)),           # transitions
        ],
        out_specs=pl.BlockSpec((1, TB), lambda b, c, sc: (0, b)),
        scratch_shapes=[
            pltpu.VMEM((L, TB), jnp.float32),           # alpha
            pltpu.VMEM((L, 1), jnp.float32),            # row max of trans
            pltpu.VMEM((L, L), jnp.float32),            # exp(trans - rowmax)
            pltpu.VMEM((t_chunk * L, TB), jnp.float32), # transposed logits chunk
        ],
    )
    norm2d = pl.pallas_call(
        kernel,
        out_shape=jax.ShapeDtypeStruct((1, B_pad), jnp.float32),
        grid_spec=grid_spec,
        compiler_params=pltpu.CompilerParams(
            dimension_semantics=("parallel", "arbitrary")),
    )(sched, logits2d, length2d, transitions.astype(jnp.float32))
    return norm2d[0, :B]


def crf_forward_ref(logits, length, transitions, start_idx, stop_idx):
    """Pure-JAX reference mirroring the PyTorch forward exactly."""
    B, S, L = logits.shape
    alpha = jnp.full((B, L), -10000.0, dtype=jnp.float32).at[:, start_idx].set(0.0)
    for t in range(S):
        logit = logits[:, t, :]
        mat = transitions[None, :, :] + alpha[:, None, :] + logit[:, :, None]
        alpha_nxt = _lse(mat, 2)
        mask = (length > t)[:, None]
        alpha = jnp.where(mask, alpha_nxt, alpha)
    alpha = alpha + transitions[stop_idx][None, :]
    return _lse(alpha, 1)


if __name__ == "__main__":
    # Deterministic synthetic setup (no checkpoint load).
    vocab_size = 6
    n_labels = vocab_size + 2          # 8
    start_idx = n_labels - 2           # 6
    stop_idx = n_labels - 1            # 7
    batch_size, seq_len = 4, 8

    key = jax.random.PRNGKey(0)
    k_trans, k_logits = jax.random.split(key)
    transitions = jax.random.normal(k_trans, (n_labels, n_labels), dtype=jnp.float32)
    logits = jax.random.normal(k_logits, (batch_size, seq_len, n_labels),
                               dtype=jnp.float32)
    length = jnp.array([8, 5, 3, 8], dtype=jnp.int32)

    norm = crf_forward(logits, length, transitions, start_idx, stop_idx)
    norm = jax.block_until_ready(norm)

    norm_ref = crf_forward_ref(logits, length, transitions, start_idx, stop_idx)
    np.testing.assert_allclose(np.asarray(norm), np.asarray(norm_ref),
                               rtol=1e-5, atol=1e-5)

    print("KERNEL_OK")
</pallas_src>

<mosaic_0001>
module attributes {stable_mosaic.version = 11 : i64} {
  func.func @kernel(%arg0: i32, %arg1: i32, %arg2: memref<2xi32, #tpu.memory_space<smem>>, %arg3: memref<128x128xf32, #tpu.memory_space<vmem>>, %arg4: memref<1x128xi32, #tpu.memory_space<vmem>>, %arg5: memref<8x8xf32, #tpu.memory_space<vmem>>, %arg6: memref<1x128xf32, #tpu.memory_space<vmem>>, %arg7: memref<8x128xf32, #tpu.memory_space<vmem>>, %arg8: memref<8x1xf32, #tpu.memory_space<vmem>>, %arg9: memref<8x8xf32, #tpu.memory_space<vmem>>, %arg10: memref<128x128xf32, #tpu.memory_space<vmem>>) attributes {dimension_semantics = [#tpu.dimension_semantics<parallel>, #tpu.dimension_semantics<arbitrary>], iteration_bounds = array<i64: 1, 1>, scalar_prefetch = 1 : i64, scratch_operands = 4 : i64, tpu.core_type = #tpu.core_type<tc>, window_params = [{transform_indices = @transform_0, window_bounds = array<i64: 128, 128>}, {transform_indices = @transform_1, window_bounds = array<i64: 1, 128>}, {pipeline_mode = #tpu.pipeline_mode<synchronous>, transform_indices = @transform_2, window_bounds = array<i64: 8, 8>}, {transform_indices = @transform_3, window_bounds = array<i64: 1, 128>}]} {
    %c0 = arith.constant 0 : index
    %0 = memref.load %arg2[%c0] : memref<2xi32, #tpu.memory_space<smem>>
    %c0_i32 = arith.constant 0 : i32
    %1 = arith.cmpi eq, %arg1, %c0_i32 : i32
    %2 = arith.extui %1 : i1 to i32
    %c0_i32_0 = arith.constant 0 : i32
    %3 = arith.cmpi ne, %2, %c0_i32_0 : i32
    scf.if %3 {
      %11 = tpu.iota {dimensions = array<i32: 0>} : vector<8x128xi32>
      %c6_i32 = arith.constant 6 : i32
      %12 = vector.broadcast %c6_i32 : i32 to vector<8x128xi32>
      %13 = arith.cmpi eq, %11, %12 : vector<8x128xi32>
      %cst = arith.constant 0.000000e+00 : f32
      %cst_4 = arith.constant -1.000000e+04 : f32
      %14 = vector.broadcast %cst : f32 to vector<8x128xf32>
      %15 = vector.broadcast %cst_4 : f32 to vector<8x128xf32>
      %16 = arith.select %13, %14, %15 : vector<8x128xi1>, vector<8x128xf32>
      %c0_5 = arith.constant 0 : index
      %c0_6 = arith.constant 0 : index
      %17 = vector.load %arg7[%c0_5, %c0_6] : memref<8x128xf32, #tpu.memory_space<vmem>>, vector<8x128xf32>
      tpu.vector_store %arg7[%c0_5, %c0_6], %16 {strides = array<i32>} : memref<8x128xf32, #tpu.memory_space<vmem>>, vector<8x128xf32>,
      %c0_7 = arith.constant 0 : index
      %c0_8 = arith.constant 0 : index
      %18 = vector.load %arg5[%c0_7, %c0_8] : memref<8x8xf32, #tpu.memory_space<vmem>>, vector<8x8xf32>
      %cst_9 = arith.constant dense<0xFF800000> : vector<8xf32>
      %19 = vector.multi_reduction <maximumf>, %18, %cst_9 [1] : vector<8x8xf32> to vector<8xf32>
      %20 = vector.shape_cast %19 : vector<8xf32> to vector<8x1xf32>
      %c0_10 = arith.constant 0 : index
      %c0_11 = arith.constant 0 : index
      %21 = vector.load %arg8[%c0_10, %c0_11] : memref<8x1xf32, #tpu.memory_space<vmem>>, vector<8x1xf32>
      tpu.vector_store %arg8[%c0_10, %c0_11], %20 {strides = array<i32>} : memref<8x1xf32, #tpu.memory_space<vmem>>, vector<8x1xf32>,
      %22 = vector.broadcast %20 : vector<8x1xf32> to vector<8x8xf32>
      %23 = arith.subf %18, %22 : vector<8x8xf32>
      %24 = math.exp %23 : vector<8x8xf32>
      %c0_12 = arith.constant 0 : index
      %c0_13 = arith.constant 0 : index
      %25 = vector.load %arg9[%c0_12, %c0_13] : memref<8x8xf32, #tpu.memory_space<vmem>>, vector<8x8xf32>
      tpu.vector_store %arg9[%c0_12, %c0_13], %24 {strides = array<i32>} : memref<8x8xf32, #tpu.memory_space<vmem>>, vector<8x8xf32>,
    } else {
    }
    %c16_i32 = arith.constant 16 : i32
    %4 = arith.muli %arg1, %c16_i32 : i32
    %5 = arith.cmpi slt, %4, %0 : i32
    %6 = arith.extui %5 : i1 to i32
    %c0_i32_1 = arith.constant 0 : i32
    %7 = arith.cmpi ne, %6, %c0_i32_1 : i32
    scf.if %7 {
      %c0_4 = arith.constant 0 : index
      %c0_5 = arith.constant 0 : index
      %11 = vector.load %arg3[%c0_4, %c0_5] : memref<128x128xf32, #tpu.memory_space<vmem>>, vector<128x128xf32>
      %12 = tpu.transpose %11, [1, 0] : vector<128x128xf32> -> vector<128x128xf32>
      %c0_6 = arith.constant 0 : index
      %c0_7 = arith.constant 0 : index
      %13 = vector.load %arg10[%c0_6, %c0_7] : memref<128x128xf32, #tpu.memory_space<vmem>>, vector<128x128xf32>
      tpu.vector_store %arg10[%c0_6, %c0_7], %12 {strides = array<i32>} : memref<128x128xf32, #tpu.memory_space<vmem>>, vector<128x128xf32>,
      %c0_8 = arith.constant 0 : index
      %c0_9 = arith.constant 0 : index
      %14 = vector.load %arg9[%c0_8, %c0_9] : memref<8x8xf32, #tpu.memory_space<vmem>>, vector<8x8xf32>
      %c0_10 = arith.constant 0 : index
      %c0_11 = arith.constant 0 : index
      %15 = vector.load %arg8[%c0_10, %c0_11] : memref<8x1xf32, #tpu.memory_space<vmem>>, vector<8x1xf32>
      %16 = vector.shape_cast %15 : vector<8x1xf32> to vector<8x1xf32>
      %17 = vector.broadcast %16 : vector<8x1xf32> to vector<8x128xf32>
      %c0_12 = arith.constant 0 : index
      %c0_13 = arith.constant 0 : index
      %18 = vector.load %arg4[%c0_12, %c0_13] : memref<1x128xi32, #tpu.memory_space<vmem>>, vector<1x128xi32>
      %c16_i32_14 = arith.constant 16 : i32
      %19 = arith.muli %arg1, %c16_i32_14 : i32
      %c0_15 = arith.constant 0 : index
      %c0_16 = arith.constant 0 : index
      %20 = vector.load %arg7[%c0_15, %c0_16] : memref<8x128xf32, #tpu.memory_space<vmem>>, vector<8x128xf32>
      %c0_i32_17 = arith.constant 0 : i32
      %c8_i32 = arith.constant 8 : i32
      %21 = arith.muli %c0_i32_17, %c8_i32 : i32
      %22 = tpu.assume_multiple %21, 8 : i32
      %23 = arith.index_cast %22 : i32 to index
      %c0_18 = arith.constant 0 : index
      %24 = vector.load %arg10[%23, %c0_18] : memref<128x128xf32, #tpu.memory_space<vmem>>, vector<8x128xf32>
      %cst = arith.constant dense<0xFF800000> : vector<128xf32>
      %25 = vector.multi_reduction <maximumf>, %20, %cst [0] : vector<8x128xf32> to vector<128xf32>
      %26 = vector.shape_cast %25 : vector<128xf32> to vector<1x128xf32>
      %27 = vector.broadcast %26 : vector<1x128xf32> to vector<8x128xf32>
      %28 = arith.subf %20, %27 : vector<8x128xf32>
      %29 = math.exp %28 : vector<8x128xf32>
      %cst_19 = arith.constant dense<0.000000e+00> : vector<8x128xf32>
      %30 = tpu.matmul %14, %29, %cst_19 {dimension_numbers = #tpu.dot_dimension_numbers<[1], [0], [0], [1], [0, 0, 1, 1], [], []>} : vector<8x8xf32>, vector<8x128xf32>, vector<8x128xf32> -> vector<8x128xf32>
      %cst_20 = arith.constant 9.99999991E-38 : f32
      %31 = vector.broadcast %cst_20 : f32 to vector<8x128xf32>
      %32 = arith.maximumf %30, %31 : vector<8x128xf32>
      %33 = vector.broadcast %26 : vector<1x128xf32> to vector<8x128xf32>
      %34 = arith.addf %24, %33 : vector<8x128xf32>
      %35 = arith.addf %34, %17 : vector<8x128xf32>
      %36 = math.log %32 : vector<8x128xf32>
      %37 = arith.addf %35, %36 : vector<8x128xf32>
      %38 = arith.addi %19, %c0_i32_17 : i32
      %39 = vector.broadcast %38 : i32 to vector<1x128xi32>
      %40 = arith.cmpi sgt, %18, %39 : vector<1x128xi32>
      %41 = vector.shape_cast %40 : vector<1x128xi1> to vector<1x128xi1>
      %42 = vector.broadcast %41 : vector<1x128xi1> to vector<8x128xi1>
      %43 = arith.select %42, %37, %20 : vector<8x128xi1>, vector<8x128xf32>
      %c1_i32 = arith.constant 1 : i32
      %c8_i32_21 = arith.constant 8 : i32
      %44 = arith.muli %c1_i32, %c8_i32_21 : i32
      %45 = tpu.assume_multiple %44, 8 : i32
      %46 = arith.index_cast %45 : i32 to index
      %c0_22 = arith.constant 0 : index
      %47 = vector.load %arg10[%46, %c0_22] : memref<128x128xf32, #tpu.memory_space<vmem>>, vector<8x128xf32>
      %cst_23 = arith.constant dense<0xFF800000> : vector<128xf32>
      %48 = vector.multi_reduction <maximumf>, %43, %cst_23 [0] : vector<8x128xf32> to vector<128xf32>
      %49 = vector.shape_cast %48 : vector<128xf32> to vector<1x128xf32>
      %50 = vector.broadcast %49 : vector<1x128xf32> to vector<8x128xf32>
      %51 = arith.subf %43, %50 : vector<8x128xf32>
      %52 = math.exp %51 : vector<8x128xf32>
      %cst_24 = arith.constant dense<0.000000e+00> : vector<8x128xf32>
      %53 = tpu.matmul %14, %52, %cst_24 {dimension_numbers = #tpu.dot_dimension_numbers<[1], [0], [0], [1], [0, 0, 1, 1], [], []>} : vector<8x8xf32>, vector<8x128xf32>, vector<8x128xf32> -> vector<8x128xf32>
      %cst_25 = arith.constant 9.99999991E-38 : f32
      %54 = vector.broadcast %cst_25 : f32 to vector<8x128xf32>
      %55 = arith.maximumf %53, %54 : vector<8x128xf32>
      %56 = vector.broadcast %49 : vector<1x128xf32> to vector<8x128xf32>
      %57 = arith.addf %47, %56 : vector<8x128xf32>
      %58 = arith.addf %57, %17 : vector<8x128xf32>
      %59 = math.log %55 : vector<8x128xf32>
      %60 = arith.addf %58, %59 : vector<8x128xf32>
      %61 = arith.addi %19, %c1_i32 : i32
      %62 = vector.broadcast %61 : i32 to vector<1x128xi32>
      %63 = arith.cmpi sgt, %18, %62 : vector<1x128xi32>
      %64 = vector.shape_cast %63 : vector<1x128xi1> to vector<1x128xi1>
      %65 = vector.broadcast %64 : vector<1x128xi1> to vector<8x128xi1>
      %66 = arith.select %65, %60, %43 : vector<8x128xi1>, vector<8x128xf32>
      %c2_i32 = arith.constant 2 : i32
      %c8_i32_26 = arith.constant 8 : i32
      %67 = arith.muli %c2_i32, %c8_i32_26 : i32
      %68 = tpu.assume_multiple %67, 8 : i32
      %69 = arith.index_cast %68 : i32 to index
      %c0_27 = arith.constant 0 : index
      %70 = vector.load %arg10[%69, %c0_27] : memref<128x128xf32, #tpu.memory_space<vmem>>, vector<8x128xf32>
      %cst_28 = arith.constant dense<0xFF800000> : vector<128xf32>
      %71 = vector.multi_reduction <maximumf>, %66, %cst_28 [0] : vector<8x128xf32> to vector<128xf32>
      %72 = vector.shape_cast %71 : vector<128xf32> to vector<1x128xf32>
      %73 = vector.broadcast %72 : vector<1x128xf32> to vector<8x128xf32>
      %74 = arith.subf %66, %73 : vector<8x128xf32>
      %75 = math.exp %74 : vector<8x128xf32>
      %cst_29 = arith.constant dense<0.000000e+00> : vector<8x128xf32>
      %76 = tpu.matmul %14, %75, %cst_29 {dimension_numbers = #tpu.dot_dimension_numbers<[1], [0], [0], [1], [0, 0, 1, 1], [], []>} : vector<8x8xf32>, vector<8x128xf32>, vector<8x128xf32> -> vector<8x128xf32>
      %cst_30 = arith.constant 9.99999991E-38 : f32
      %77 = vector.broadcast %cst_30 : f32 to vector<8x128xf32>
      %78 = arith.maximumf %76, %77 : vector<8x128xf32>
      %79 = vector.broadcast %72 : vector<1x128xf32> to vector<8x128xf32>
      %80 = arith.addf %70, %79 : vector<8x128xf32>
      %81 = arith.addf %80, %17 : vector<8x128xf32>
      %82 = math.log %78 : vector<8x128xf32>
      %83 = arith.addf %81, %82 : vector<8x128xf32>
      %84 = arith.addi %19, %c2_i32 : i32
      %85 = vector.broadcast %84 : i32 to vector<1x128xi32>
      %86 = arith.cmpi sgt, %18, %85 : vector<1x128xi32>
      %87 = vector.shape_cast %86 : vector<1x128xi1> to vector<1x128xi1>
      %88 = vector.broadcast %87 : vector<1x128xi1> to vector<8x128xi1>
      %89 = arith.select %88, %83, %66 : vector<8x128xi1>, vector<8x128xf32>
      %c3_i32 = arith.constant 3 : i32
      %c8_i32_31 = arith.constant 8 : i32
      %90 = arith.muli %c3_i32, %c8_i32_31 : i32
      %91 = tpu.assume_multiple %90, 8 : i32
      %92 = arith.index_cast %91 : i32 to index
      %c0_32 = arith.constant 0 : index
      %93 = vector.load %arg10[%92, %c0_32] : memref<128x128xf32, #tpu.memory_space<vmem>>, vector<8x128xf32>
      %cst_33 = arith.constant dense<0xFF800000> : vector<128xf32>
      %94 = vector.multi_reduction <maximumf>, %89, %cst_33 [0] : vector<8x128xf32> to vector<128xf32>
      %95 = vector.shape_cast %94 : vector<128xf32> to vector<1x128xf32>
      %96 = vector.broadcast %95 : vector<1x128xf32> to vector<8x128xf32>
      %97 = arith.subf %89, %96 : vector<8x128xf32>
      %98 = math.exp %97 : vector<8x128xf32>
      %cst_34 = arith.constant dense<0.000000e+00> : vector<8x128xf32>
      %99 = tpu.matmul %14, %98, %cst_34 {dimension_numbers = #tpu.dot_dimension_numbers<[1], [0], [0], [1], [0, 0, 1, 1], [], []>} : vector<8x8xf32>, vector<8x128xf32>, vector<8x128xf32> -> vector<8x128xf32>
      %cst_35 = arith.constant 9.99999991E-38 : f32
      %100 = vector.broadcast %cst_35 : f32 to vector<8x128xf32>
      %101 = arith.maximumf %99, %100 : vector<8x128xf32>
      %102 = vector.broadcast %95 : vector<1x128xf32> to vector<8x128xf32>
      %103 = arith.addf %93, %102 : vector<8x128xf32>
      %104 = arith.addf %103, %17 : vector<8x128xf32>
      %105 = math.log %101 : vector<8x128xf32>
      %106 = arith.addf %104, %105 : vector<8x128xf32>
      %107 = arith.addi %19, %c3_i32 : i32
      %108 = vector.broadcast %107 : i32 to vector<1x128xi32>
      %109 = arith.cmpi sgt, %18, %108 : vector<1x128xi32>
      %110 = vector.shape_cast %109 : vector<1x128xi1> to vector<1x128xi1>
      %111 = vector.broadcast %110 : vector<1x128xi1> to vector<8x128xi1>
      %112 = arith.select %111, %106, %89 : vector<8x128xi1>, vector<8x128xf32>
      %c4_i32 = arith.constant 4 : i32
      %c8_i32_36 = arith.constant 8 : i32
      %113 = arith.muli %c4_i32, %c8_i32_36 : i32
      %114 = tpu.assume_multiple %113, 8 : i32
      %115 = arith.index_cast %114 : i32 to index
      %c0_37 = arith.constant 0 : index
      %116 = vector.load %arg10[%115, %c0_37] : memref<128x128xf32, #tpu.memory_space<vmem>>, vector<8x128xf32>
      %cst_38 = arith.constant dense<0xFF800000> : vector<128xf32>
      %117 = vector.multi_reduction <maximumf>, %112, %cst_38 [0] : vector<8x128xf32> to vector<128xf32>
      %118 = vector.shape_cast %117 : vector<128xf32> to vector<1x128xf32>
      %119 = vector.broadcast %118 : vector<1x128xf32> to vector<8x128xf32>
      %120 = arith.subf %112, %119 : vector<8x128xf32>
      %121 = math.exp %120 : vector<8x128xf32>
      %cst_39 = arith.constant dense<0.000000e+00> : vector<8x128xf32>
      %122 = tpu.matmul %14, %121, %cst_39 {dimension_numbers = #tpu.dot_dimension_numbers<[1], [0], [0], [1], [0, 0, 1, 1], [], []>} : vector<8x8xf32>, vector<8x128xf32>, vector<8x128xf32> -> vector<8x128xf32>
      %cst_40 = arith.constant 9.99999991E-38 : f32
      %123 = vector.broadcast %cst_40 : f32 to vector<8x128xf32>
      %124 = arith.maximumf %122, %123 : vector<8x128xf32>
      %125 = vector.broadcast %118 : vector<1x128xf32> to vector<8x128xf32>
      %126 = arith.addf %116, %125 : vector<8x128xf32>
      %127 = arith.addf %126, %17 : vector<8x128xf32>
      %128 = math.log %124 : vector<8x128xf32>
      %129 = arith.addf %127, %128 : vector<8x128xf32>
      %130 = arith.addi %19, %c4_i32 : i32
      %131 = vector.broadcast %130 : i32 to vector<1x128xi32>
      %132 = arith.cmpi sgt, %18, %131 : vector<1x128xi32>
      %133 = vector.shape_cast %132 : vector<1x128xi1> to vector<1x128xi1>
      %134 = vector.broadcast %133 : vector<1x128xi1> to vector<8x128xi1>
      %135 = arith.select %134, %129, %112 : vector<8x128xi1>, vector<8x128xf32>
      %c5_i32 = arith.constant 5 : i32
      %c8_i32_41 = arith.constant 8 : i32
      %136 = arith.muli %c5_i32, %c8_i32_41 : i32
      %137 = tpu.assume_multiple %136, 8 : i32
      %138 = arith.index_cast %137 : i32 to index
      %c0_42 = arith.constant 0 : index
      %139 = vector.load %arg10[%138, %c0_42] : memref<128x128xf32, #tpu.memory_space<vmem>>, vector<8x128xf32>
      %cst_43 = arith.constant dense<0xFF800000> : vector<128xf32>
      %140 = vector.multi_reduction <maximumf>, %135, %cst_43 [0] : vector<8x128xf32> to vector<128xf32>
      %141 = vector.shape_cast %140 : vector<128xf32> to vector<1x128xf32>
      %142 = vector.broadcast %141 : vector<1x128xf32> to vector<8x128xf32>
      %143 = arith.subf %135, %142 : vector<8x128xf32>
      %144 = math.exp %143 : vector<8x128xf32>
      %cst_44 = arith.constant dense<0.000000e+00> : vector<8x128xf32>
      %145 = tpu.matmul %14, %144, %cst_44 {dimension_numbers = #tpu.dot_dimension_numbers<[1], [0], [0], [1], [0, 0, 1, 1], [], []>} : vector<8x8xf32>, vector<8x128xf32>, vector<8x128xf32> -> vector<8x128xf32>
      %cst_45 = arith.constant 9.99999991E-38 : f32
      %146 = vector.broadcast %cst_45 : f32 to vector<8x128xf32>
      %147 = arith.maximumf %145, %146 : vector<8x128xf32>
      %148 = vector.broadcast %141 : vector<1x128xf32> to vector<8x128xf32>
      %149 = arith.addf %139, %148 : vector<8x128xf32>
      %150 = arith.addf %149, %17 : vector<8x128xf32>
      %151 = math.log %147 : vector<8x128xf32>
      %152 = arith.addf %150, %151 : vector<8x128xf32>
      %153 = arith.addi %19, %c5_i32 : i32
      %154 = vector.broadcast %153 : i32 to vector<1x128xi32>
      %155 = arith.cmpi sgt, %18, %154 : vector<1x128xi32>
      %156 = vector.shape_cast %155 : vector<1x128xi1> to vector<1x128xi1>
      %157 = vector.broadcast %156 : vector<1x128xi1> to vector<8x128xi1>
      %158 = arith.select %157, %152, %135 : vector<8x128xi1>, vector<8x128xf32>
      %c6_i32 = arith.constant 6 : i32
      %c8_i32_46 = arith.constant 8 : i32
      %159 = arith.muli %c6_i32, %c8_i32_46 : i32
      %160 = tpu.assume_multiple %159, 8 : i32
      %161 = arith.index_cast %160 : i32 to index
      %c0_47 = arith.constant 0 : index
      %162 = vector.load %arg10[%161, %c0_47] : memref<128x128xf32, #tpu.memory_space<vmem>>, vector<8x128xf32>
      %cst_48 = arith.constant dense<0xFF800000> : vector<128xf32>
      %163 = vector.multi_reduction <maximumf>, %158, %cst_48 [0] : vector<8x128xf32> to vector<128xf32>
      %164 = vector.shape_cast %163 : vector<128xf32> to vector<1x128xf32>
      %165 = vector.broadcast %164 : vector<1x128xf32> to vector<8x128xf32>
      %166 = arith.subf %158, %165 : vector<8x128xf32>
      %167 = math.exp %166 : vector<8x128xf32>
      %cst_49 = arith.constant dense<0.000000e+00> : vector<8x128xf32>
      %168 = tpu.matmul %14, %167, %cst_49 {dimension_numbers = #tpu.dot_dimension_numbers<[1], [0], [0], [1], [0, 0, 1, 1], [], []>} : vector<8x8xf32>, vector<8x128xf32>, vector<8x128xf32> -> vector<8x128xf32>
      %cst_50 = arith.constant 9.99999991E-38 : f32
      %169 = vector.broadcast %cst_50 : f32 to vector<8x128xf32>
      %170 = arith.maximumf %168, %169 : vector<8x128xf32>
      %171 = vector.broadcast %164 : vector<1x128xf32> to vector<8x128xf32>
      %172 = arith.addf %162, %171 : vector<8x128xf32>
      %173 = arith.addf %172, %17 : vector<8x128xf32>
      %174 = math.log %170 : vector<8x128xf32>
      %175 = arith.addf %173, %174 : vector<8x128xf32>
      %176 = arith.addi %19, %c6_i32 : i32
      %177 = vector.broadcast %176 : i32 to vector<1x128xi32>
      %178 = arith.cmpi sgt, %18, %177 : vector<1x128xi32>
      %179 = vector.shape_cast %178 : vector<1x128xi1> to vector<1x128xi1>
      %180 = vector.broadcast %179 : vector<1x128xi1> to vector<8x128xi1>
      %181 = arith.select %180, %175, %158 : vector<8x128xi1>, vector<8x128xf32>
      %c7_i32 = arith.constant 7 : i32
      %c8_i32_51 = arith.constant 8 : i32
      %182 = arith.muli %c7_i32, %c8_i32_51 : i32
      %183 = tpu.assume_multiple %182, 8 : i32
      %184 = arith.index_cast %183 : i32 to index
      %c0_52 = arith.constant 0 : index
      %185 = vector.load %arg10[%184, %c0_52] : memref<128x128xf32, #tpu.memory_space<vmem>>, vector<8x128xf32>
      %cst_53 = arith.constant dense<0xFF800000> : vector<128xf32>
      %186 = vector.multi_reduction <maximumf>, %181, %cst_53 [0] : vector<8x128xf32> to vector<128xf32>
      %187 = vector.shape_cast %186 : vector<128xf32> to vector<1x128xf32>
      %188 = vector.broadcast %187 : vector<1x128xf32> to vector<8x128xf32>
      %189 = arith.subf %181, %188 : vector<8x128xf32>
      %190 = math.exp %189 : vector<8x128xf32>
      %cst_54 = arith.constant dense<0.000000e+00> : vector<8x128xf32>
      %191 = tpu.matmul %14, %190, %cst_54 {dimension_numbers = #tpu.dot_dimension_numbers<[1], [0], [0], [1], [0, 0, 1, 1], [], []>} : vector<8x8xf32>, vector<8x128xf32>, vector<8x128xf32> -> vector<8x128xf32>
      %cst_55 = arith.constant 9.99999991E-38 : f32
      %192 = vector.broadcast %cst_55 : f32 to vector<8x128xf32>
      %193 = arith.maximumf %191, %192 : vector<8x128xf32>
      %194 = vector.broadcast %187 : vector<1x128xf32> to vector<8x128xf32>
      %195 = arith.addf %185, %194 : vector<8x128xf32>
      %196 = arith.addf %195, %17 : vector<8x128xf32>
      %197 = math.log %193 : vector<8x128xf32>
      %198 = arith.addf %196, %197 : vector<8x128xf32>
      %199 = arith.addi %19, %c7_i32 : i32
      %200 = vector.broadcast %199 : i32 to vector<1x128xi32>
      %201 = arith.cmpi sgt, %18, %200 : vector<1x128xi32>
      %202 = vector.shape_cast %201 : vector<1x128xi1> to vector<1x128xi1>
      %203 = vector.broadcast %202 : vector<1x128xi1> to vector<8x128xi1>
      %204 = arith.select %203, %198, %181 : vector<8x128xi1>, vector<8x128xf32>
      %c8_i32_56 = arith.constant 8 : i32
      %c8_i32_57 = arith.constant 8 : i32
      %205 = arith.muli %c8_i32_56, %c8_i32_57 : i32
      %206 = tpu.assume_multiple %205, 8 : i32
      %207 = arith.index_cast %206 : i32 to index
      %c0_58 = arith.constant 0 : index
      %208 = vector.load %arg10[%207, %c0_58] : memref<128x128xf32, #tpu.memory_space<vmem>>, vector<8x128xf32>
      %cst_59 = arith.constant dense<0xFF800000> : vector<128xf32>
      %209 = vector.multi_reduction <maximumf>, %204, %cst_59 [0] : vector<8x128xf32> to vector<128xf32>
      %210 = vector.shape_cast %209 : vector<128xf32> to vector<1x128xf32>
      %211 = vector.broadcast %210 : vector<1x128xf32> to vector<8x128xf32>
      %212 = arith.subf %204, %211 : vector<8x128xf32>
      %213 = math.exp %212 : vector<8x128xf32>
      %cst_60 = arith.constant dense<0.000000e+00> : vector<8x128xf32>
      %214 = tpu.matmul %14, %213, %cst_60 {dimension_numbers = #tpu.dot_dimension_numbers<[1], [0], [0], [1], [0, 0, 1, 1], [], []>} : vector<8x8xf32>, vector<8x128xf32>, vector<8x128xf32> -> vector<8x128xf32>
      %cst_61 = arith.constant 9.99999991E-38 : f32
      %215 = vector.broadcast %cst_61 : f32 to vector<8x128xf32>
      %216 = arith.maximumf %214, %215 : vector<8x128xf32>
      %217 = vector.broadcast %210 : vector<1x128xf32> to vector<8x128xf32>
      %218 = arith.addf %208, %217 : vector<8x128xf32>
      %219 = arith.addf %218, %17 : vector<8x128xf32>
      %220 = math.log %216 : vector<8x128xf32>
      %221 = arith.addf %219, %220 : vector<8x128xf32>
      %222 = arith.addi %19, %c8_i32_56 : i32
      %223 = vector.broadcast %222 : i32 to vector<1x128xi32>
      %224 = arith.cmpi sgt, %18, %223 : vector<1x128xi32>
      %225 = vector.shape_cast %224 : vector<1x128xi1> to vector<1x128xi1>
      %226 = vector.broadcast %225 : vector<1x128xi1> to vector<8x128xi1>
      %227 = arith.select %226, %221, %204 : vector<8x128xi1>, vector<8x128xf32>
      %c9_i32 = arith.constant 9 : i32
      %c8_i32_62 = arith.constant 8 : i32
      %228 = arith.muli %c9_i32, %c8_i32_62 : i32
      %229 = tpu.assume_multiple %228, 8 : i32
      %230 = arith.index_cast %229 : i32 to index
      %c0_63 = arith.constant 0 : index
      %231 = vector.load %arg10[%230, %c0_63] : memref<128x128xf32, #tpu.memory_space<vmem>>, vector<8x128xf32>
      %cst_64 = arith.constant dense<0xFF800000> : vector<128xf32>
      %232 = vector.multi_reduction <maximumf>, %227, %cst_64 [0] : vector<8x128xf32> to vector<128xf32>
      %233 = vector.shape_cast %232 : vector<128xf32> to vector<1x128xf32>
      %234 = vector.broadcast %233 : vector<1x128xf32> to vector<8x128xf32>
      %235 = arith.subf %227, %234 : vector<8x128xf32>
      %236 = math.exp %235 : vector<8x128xf32>
      %cst_65 = arith.constant dense<0.000000e+00> : vector<8x128xf32>
      %237 = tpu.matmul %14, %236, %cst_65 {dimension_numbers = #tpu.dot_dimension_numbers<[1], [0], [0], [1], [0, 0, 1, 1], [], []>} : vector<8x8xf32>, vector<8x128xf32>, vector<8x128xf32> -> vector<8x128xf32>
      %cst_66 = arith.constant 9.99999991E-38 : f32
      %238 = vector.broadcast %cst_66 : f32 to vector<8x128xf32>
      %239 = arith.maximumf %237, %238 : vector<8x128xf32>
      %240 = vector.broadcast %233 : vector<1x128xf32> to vector<8x128xf32>
      %241 = arith.addf %231, %240 : vector<8x128xf32>
      %242 = arith.addf %241, %17 : vector<8x128xf32>
      %243 = math.log %239 : vector<8x128xf32>
      %244 = arith.addf %242, %243 : vector<8x128xf32>
      %245 = arith.addi %19, %c9_i32 : i32
      %246 = vector.broadcast %245 : i32 to vector<1x128xi32>
      %247 = arith.cmpi sgt, %18, %246 : vector<1x128xi32>
      %248 = vector.shape_cast %247 : vector<1x128xi1> to vector<1x128xi1>
      %249 = vector.broadcast %248 : vector<1x128xi1> to vector<8x128xi1>
      %250 = arith.select %249, %244, %227 : vector<8x128xi1>, vector<8x128xf32>
      %c10_i32 = arith.constant 10 : i32
      %c8_i32_67 = arith.constant 8 : i32
      %251 = arith.muli %c10_i32, %c8_i32_67 : i32
      %252 = tpu.assume_multiple %251, 8 : i32
      %253 = arith.index_cast %252 : i32 to index
      %c0_68 = arith.constant 0 : index
      %254 = vector.load %arg10[%253, %c0_68] : memref<128x128xf32, #tpu.memory_space<vmem>>, vector<8x128xf32>
      %cst_69 = arith.constant dense<0xFF800000> : vector<128xf32>
      %255 = vector.multi_reduction <maximumf>, %250, %cst_69 [0] : vector<8x128xf32> to vector<128xf32>
      %256 = vector.shape_cast %255 : vector<128xf32> to vector<1x128xf32>
      %257 = vector.broadcast %256 : vector<1x128xf32> to vector<8x128xf32>
      %258 = arith.subf %250, %257 : vector<8x128xf32>
      %259 = math.exp %258 : vector<8x128xf32>
      %cst_70 = arith.constant dense<0.000000e+00> : vector<8x128xf32>
      %260 = tpu.matmul %14, %259, %cst_70 {dimension_numbers = #tpu.dot_dimension_numbers<[1], [0], [0], [1], [0, 0, 1, 1], [], []>} : vector<8x8xf32>, vector<8x128xf32>, vector<8x128xf32> -> vector<8x128xf32>
      %cst_71 = arith.constant 9.99999991E-38 : f32
      %261 = vector.broadcast %cst_71 : f32 to vector<8x128xf32>
      %262 = arith.maximumf %260, %261 : vector<8x128xf32>
      %263 = vector.broadcast %256 : vector<1x128xf32> to vector<8x128xf32>
      %264 = arith.addf %254, %263 : vector<8x128xf32>
      %265 = arith.addf %264, %17 : vector<8x128xf32>
      %266 = math.log %262 : vector<8x128xf32>
      %267 = arith.addf %265, %266 : vector<8x128xf32>
      %268 = arith.addi %19, %c10_i32 : i32
      %269 = vector.broadcast %268 : i32 to vector<1x128xi32>
      %270 = arith.cmpi sgt, %18, %269 : vector<1x128xi32>
      %271 = vector.shape_cast %270 : vector<1x128xi1> to vector<1x128xi1>
      %272 = vector.broadcast %271 : vector<1x128xi1> to vector<8x128xi1>
      %273 = arith.select %272, %267, %250 : vector<8x128xi1>, vector<8x128xf32>
      %c11_i32 = arith.constant 11 : i32
      %c8_i32_72 = arith.constant 8 : i32
      %274 = arith.muli %c11_i32, %c8_i32_72 : i32
      %275 = tpu.assume_multiple %274, 8 : i32
      %276 = arith.index_cast %275 : i32 to index
      %c0_73 = arith.constant 0 : index
      %277 = vector.load %arg10[%276, %c0_73] : memref<128x128xf32, #tpu.memory_space<vmem>>, vector<8x128xf32>
      %cst_74 = arith.constant dense<0xFF800000> : vector<128xf32>
      %278 = vector.multi_reduction <maximumf>, %273, %cst_74 [0] : vector<8x128xf32> to vector<128xf32>
      %279 = vector.shape_cast %278 : vector<128xf32> to vector<1x128xf32>
      %280 = vector.broadcast %279 : vector<1x128xf32> to vector<8x128xf32>
      %281 = arith.subf %273, %280 : vector<8x128xf32>
      %282 = math.exp %281 : vector<8x128xf32>
      %cst_75 = arith.constant dense<0.000000e+00> : vector<8x128xf32>
      %283 = tpu.matmul %14, %282, %cst_75 {dimension_numbers = #tpu.dot_dimension_numbers<[1], [0], [0], [1], [0, 0, 1, 1], [], []>} : vector<8x8xf32>, vector<8x128xf32>, vector<8x128xf32> -> vector<8x128xf32>
      %cst_76 = arith.constant 9.99999991E-38 : f32
      %284 = vector.broadcast %cst_76 : f32 to vector<8x128xf32>
      %285 = arith.maximumf %283, %284 : vector<8x128xf32>
      %286 = vector.broadcast %279 : vector<1x128xf32> to vector<8x128xf32>
      %287 = arith.addf %277, %286 : vector<8x128xf32>
      %288 = arith.addf %287, %17 : vector<8x128xf32>
      %289 = math.log %285 : vector<8x128xf32>
      %290 = arith.addf %288, %289 : vector<8x128xf32>
      %291 = arith.addi %19, %c11_i32 : i32
      %292 = vector.broadcast %291 : i32 to vector<1x128xi32>
      %293 = arith.cmpi sgt, %18, %292 : vector<1x128xi32>
      %294 = vector.shape_cast %293 : vector<1x128xi1> to vector<1x128xi1>
      %295 = vector.broadcast %294 : vector<1x128xi1> to vector<8x128xi1>
      %296 = arith.select %295, %290, %273 : vector<8x128xi1>, vector<8x128xf32>
      %c12_i32 = arith.constant 12 : i32
      %c8_i32_77 = arith.constant 8 : i32
      %297 = arith.muli %c12_i32, %c8_i32_77 : i32
      %298 = tpu.assume_multiple %297, 8 : i32
      %299 = arith.index_cast %298 : i32 to index
      %c0_78 = arith.constant 0 : index
      %300 = vector.load %arg10[%299, %c0_78] : memref<128x128xf32, #tpu.memory_space<vmem>>, vector<8x128xf32>
      %cst_79 = arith.constant dense<0xFF800000> : vector<128xf32>
      %301 = vector.multi_reduction <maximumf>, %296, %cst_79 [0] : vector<8x128xf32> to vector<128xf32>
      %302 = vector.shape_cast %301 : vector<128xf32> to vector<1x128xf32>
      %303 = vector.broadcast %302 : vector<1x128xf32> to vector<8x128xf32>
      %304 = arith.subf %296, %303 : vector<8x128xf32>
      %305 = math.exp %304 : vector<8x128xf32>
      %cst_80 = arith.constant dense<0.000000e+00> : vector<8x128xf32>
      %306 = tpu.matmul %14, %305, %cst_80 {dimension_numbers = #tpu.dot_dimension_numbers<[1], [0], [0], [1], [0, 0, 1, 1], [], []>} : vector<8x8xf32>, vector<8x128xf32>, vector<8x128xf32> -> vector<8x128xf32>
      %cst_81 = arith.constant 9.99999991E-38 : f32
      %307 = vector.broadcast %cst_81 : f32 to vector<8x128xf32>
      %308 = arith.maximumf %306, %307 : vector<8x128xf32>
      %309 = vector.broadcast %302 : vector<1x128xf32> to vector<8x128xf32>
      %310 = arith.addf %300, %309 : vector<8x128xf32>
      %311 = arith.addf %310, %17 : vector<8x128xf32>
      %312 = math.log %308 : vector<8x128xf32>
      %313 = arith.addf %311, %312 : vector<8x128xf32>
      %314 = arith.addi %19, %c12_i32 : i32
      %315 = vector.broadcast %314 : i32 to vector<1x128xi32>
      %316 = arith.cmpi sgt, %18, %315 : vector<1x128xi32>
      %317 = vector.shape_cast %316 : vector<1x128xi1> to vector<1x128xi1>
      %318 = vector.broadcast %317 : vector<1x128xi1> to vector<8x128xi1>
      %319 = arith.select %318, %313, %296 : vector<8x128xi1>, vector<8x128xf32>
      %c13_i32 = arith.constant 13 : i32
      %c8_i32_82 = arith.constant 8 : i32
      %320 = arith.muli %c13_i32, %c8_i32_82 : i32
      %321 = tpu.assume_multiple %320, 8 : i32
      %322 = arith.index_cast %321 : i32 to index
      %c0_83 = arith.constant 0 : index
      %323 = vector.load %arg10[%322, %c0_83] : memref<128x128xf32, #tpu.memory_space<vmem>>, vector<8x128xf32>
      %cst_84 = arith.constant dense<0xFF800000> : vector<128xf32>
      %324 = vector.multi_reduction <maximumf>, %319, %cst_84 [0] : vector<8x128xf32> to vector<128xf32>
      %325 = vector.shape_cast %324 : vector<128xf32> to vector<1x128xf32>
      %326 = vector.broadcast %325 : vector<1x128xf32> to vector<8x128xf32>
      %327 = arith.subf %319, %326 : vector<8x128xf32>
      %328 = math.exp %327 : vector<8x128xf32>
      %cst_85 = arith.constant dense<0.000000e+00> : vector<8x128xf32>
      %329 = tpu.matmul %14, %328, %cst_85 {dimension_numbers = #tpu.dot_dimension_numbers<[1], [0], [0], [1], [0, 0, 1, 1], [], []>} : vector<8x8xf32>, vector<8x128xf32>, vector<8x128xf32> -> vector<8x128xf32>
      %cst_86 = arith.constant 9.99999991E-38 : f32
      %330 = vector.broadcast %cst_86 : f32 to vector<8x128xf32>
      %331 = arith.maximumf %329, %330 : vector<8x128xf32>
      %332 = vector.broadcast %325 : vector<1x128xf32> to vector<8x128xf32>
      %333 = arith.addf %323, %332 : vector<8x128xf32>
      %334 = arith.addf %333, %17 : vector<8x128xf32>
      %335 = math.log %331 : vector<8x128xf32>
      %336 = arith.addf %334, %335 : vector<8x128xf32>
      %337 = arith.addi %19, %c13_i32 : i32
      %338 = vector.broadcast %337 : i32 to vector<1x128xi32>
      %339 = arith.cmpi sgt, %18, %338 : vector<1x128xi32>
      %340 = vector.shape_cast %339 : vector<1x128xi1> to vector<1x128xi1>
      %341 = vector.broadcast %340 : vector<1x128xi1> to vector<8x128xi1>
      %342 = arith.select %341, %336, %319 : vector<8x128xi1>, vector<8x128xf32>
      %c14_i32 = arith.constant 14 : i32
      %c8_i32_87 = arith.constant 8 : i32
      %343 = arith.muli %c14_i32, %c8_i32_87 : i32
      %344 = tpu.assume_multiple %343, 8 : i32
      %345 = arith.index_cast %344 : i32 to index
      %c0_88 = arith.constant 0 : index
      %346 = vector.load %arg10[%345, %c0_88] : memref<128x128xf32, #tpu.memory_space<vmem>>, vector<8x128xf32>
      %cst_89 = arith.constant dense<0xFF800000> : vector<128xf32>
      %347 = vector.multi_reduction <maximumf>, %342, %cst_89 [0] : vector<8x128xf32> to vector<128xf32>
      %348 = vector.shape_cast %347 : vector<128xf32> to vector<1x128xf32>
      %349 = vector.broadcast %348 : vector<1x128xf32> to vector<8x128xf32>
      %350 = arith.subf %342, %349 : vector<8x128xf32>
      %351 = math.exp %350 : vector<8x128xf32>
      %cst_90 = arith.constant dense<0.000000e+00> : vector<8x128xf32>
      %352 = tpu.matmul %14, %351, %cst_90 {dimension_numbers = #tpu.dot_dimension_numbers<[1], [0], [0], [1], [0, 0, 1, 1], [], []>} : vector<8x8xf32>, vector<8x128xf32>, vector<8x128xf32> -> vector<8x128xf32>
      %cst_91 = arith.constant 9.99999991E-38 : f32
      %353 = vector.broadcast %cst_91 : f32 to vector<8x128xf32>
      %354 = arith.maximumf %352, %353 : vector<8x128xf32>
      %355 = vector.broadcast %348 : vector<1x128xf32> to vector<8x128xf32>
      %356 = arith.addf %346, %355 : vector<8x128xf32>
      %357 = arith.addf %356, %17 : vector<8x128xf32>
      %358 = math.log %354 : vector<8x128xf32>
      %359 = arith.addf %357, %358 : vector<8x128xf32>
      %360 = arith.addi %19, %c14_i32 : i32
      %361 = vector.broadcast %360 : i32 to vector<1x128xi32>
      %362 = arith.cmpi sgt, %18, %361 : vector<1x128xi32>
      %363 = vector.shape_cast %362 : vector<1x128xi1> to vector<1x128xi1>
      %364 = vector.broadcast %363 : vector<1x128xi1> to vector<8x128xi1>
      %365 = arith.select %364, %359, %342 : vector<8x128xi1>, vector<8x128xf32>
      %c15_i32 = arith.constant 15 : i32
      %c8_i32_92 = arith.constant 8 : i32
      %366 = arith.muli %c15_i32, %c8_i32_92 : i32
      %367 = tpu.assume_multiple %366, 8 : i32
      %368 = arith.index_cast %367 : i32 to index
      %c0_93 = arith.constant 0 : index
      %369 = vector.load %arg10[%368, %c0_93] : memref<128x128xf32, #tpu.memory_space<vmem>>, vector<8x128xf32>
      %cst_94 = arith.constant dense<0xFF800000> : vector<128xf32>
      %370 = vector.multi_reduction <maximumf>, %365, %cst_94 [0] : vector<8x128xf32> to vector<128xf32>
      %371 = vector.shape_cast %370 : vector<128xf32> to vector<1x128xf32>
      %372 = vector.broadcast %371 : vector<1x128xf32> to vector<8x128xf32>
      %373 = arith.subf %365, %372 : vector<8x128xf32>
      %374 = math.exp %373 : vector<8x128xf32>
      %cst_95 = arith.constant dense<0.000000e+00> : vector<8x128xf32>
      %375 = tpu.matmul %14, %374, %cst_95 {dimension_numbers = #tpu.dot_dimension_numbers<[1], [0], [0], [1], [0, 0, 1, 1], [], []>} : vector<8x8xf32>, vector<8x128xf32>, vector<8x128xf32> -> vector<8x128xf32>
      %cst_96 = arith.constant 9.99999991E-38 : f32
      %376 = vector.broadcast %cst_96 : f32 to vector<8x128xf32>
      %377 = arith.maximumf %375, %376 : vector<8x128xf32>
      %378 = vector.broadcast %371 : vector<1x128xf32> to vector<8x128xf32>
      %379 = arith.addf %369, %378 : vector<8x128xf32>
      %380 = arith.addf %379, %17 : vector<8x128xf32>
      %381 = math.log %377 : vector<8x128xf32>
      %382 = arith.addf %380, %381 : vector<8x128xf32>
      %383 = arith.addi %19, %c15_i32 : i32
      %384 = vector.broadcast %383 : i32 to vector<1x128xi32>
      %385 = arith.cmpi sgt, %18, %384 : vector<1x128xi32>
      %386 = vector.shape_cast %385 : vector<1x128xi1> to vector<1x128xi1>
      %387 = vector.broadcast %386 : vector<1x128xi1> to vector<8x128xi1>
      %388 = arith.select %387, %382, %365 : vector<8x128xi1>, vector<8x128xf32>
      %c16_i32_97 = arith.constant 16 : i32
      %c0_98 = arith.constant 0 : index
      %c0_99 = arith.constant 0 : index
      %389 = vector.load %arg7[%c0_98, %c0_99] : memref<8x128xf32, #tpu.memory_space<vmem>>, vector<8x128xf32>
      tpu.vector_store %arg7[%c0_98, %c0_99], %388 {strides = array<i32>} : memref<8x128xf32, #tpu.memory_space<vmem>>, vector<8x128xf32>,
    } else {
    }
    %c0_i32_2 = arith.constant 0 : i32
    %8 = arith.cmpi eq, %arg1, %c0_i32_2 : i32
    %9 = arith.extui %8 : i1 to i32
    %c0_i32_3 = arith.constant 0 : i32
    %10 = arith.cmpi ne, %9, %c0_i32_3 : i32
    scf.if %10 {
      %c0_4 = arith.constant 0 : index
      %c0_5 = arith.constant 0 : index
      %11 = vector.load %arg7[%c0_4, %c0_5] : memref<8x128xf32, #tpu.memory_space<vmem>>, vector<8x128xf32>
      %c7 = arith.constant 7 : index
      %c0_6 = arith.constant 0 : index
      %12 = vector.load %arg9[%c7, %c0_6] : memref<8x8xf32, #tpu.memory_space<vmem>>, vector<1x8xf32>
      %c7_7 = arith.constant 7 : index
      %c0_8 = arith.constant 0 : index
      %13 = vector.load %arg8[%c7_7, %c0_8] : memref<8x1xf32, #tpu.memory_space<vmem>>, vector<1x1xf32>
      %cst = arith.constant dense<0xFF800000> : vector<128xf32>
      %14 = vector.multi_reduction <maximumf>, %11, %cst [0] : vector<8x128xf32> to vector<128xf32>
      %15 = vector.shape_cast %14 : vector<128xf32> to vector<1x128xf32>
      %16 = vector.broadcast %15 : vector<1x128xf32> to vector<8x128xf32>
      %17 = arith.subf %11, %16 : vector<8x128xf32>
      %18 = math.exp %17 : vector<8x128xf32>
      %cst_9 = arith.constant dense<0.000000e+00> : vector<1x128xf32>
      %19 = tpu.matmul %12, %18, %cst_9 {dimension_numbers = #tpu.dot_dimension_numbers<[1], [0], [0], [1], [0, 0, 1, 1], [], []>} : vector<1x8xf32>, vector<8x128xf32>, vector<1x128xf32> -> vector<1x128xf32>
      %cst_10 = arith.constant 9.99999991E-38 : f32
      %20 = vector.broadcast %cst_10 : f32 to vector<1x128xf32>
      %21 = arith.maximumf %19, %20 : vector<1x128xf32>
      %22 = vector.broadcast %13 : vector<1x1xf32> to vector<1x128xf32>
      %23 = arith.addf %15, %22 : vector<1x128xf32>
      %24 = math.log %21 : vector<1x128xf32>
      %25 = arith.addf %23, %24 : vector<1x128xf32>
      %c0_11 = arith.constant 0 : index
      %c0_12 = arith.constant 0 : index
      %26 = vector.load %arg6[%c0_11, %c0_12] : memref<1x128xf32, #tpu.memory_space<vmem>>, vector<1x128xf32>
      tpu.vector_store %arg6[%c0_11, %c0_12], %25 {strides = array<i32>} : memref<1x128xf32, #tpu.memory_space<vmem>>, vector<1x128xf32>,
    } else {
    }
    return
  }
  func.func @transform_0(%arg0: i32, %arg1: i32, %arg2: memref<2xi32, #tpu.memory_space<smem>>) -> (i32, i32) {
    %c1 = arith.constant 1 : index
    %0 = memref.load %arg2[%c1] : memref<2xi32, #tpu.memory_space<smem>>
    %1 = arith.minsi %arg1, %0 : i32
    %c0_i32 = arith.constant 0 : i32
    return %arg0, %1 : i32, i32
  }
  func.func @transform_1(%arg0: i32, %arg1: i32, %arg2: memref<2xi32, #tpu.memory_space<smem>>) -> (i32, i32) {
    %c0_i32 = arith.constant 0 : i32
    %c0_i32_0 = arith.constant 0 : i32
    return %c0_i32, %arg0 : i32, i32
  }
  func.func @transform_2(%arg0: i32, %arg1: i32, %arg2: memref<2xi32, #tpu.memory_space<smem>>) -> (i32, i32) {
    %c0_i32 = arith.constant 0 : i32
    %c0_i32_0 = arith.constant 0 : i32
    %c0_i32_1 = arith.constant 0 : i32
    return %c0_i32, %c0_i32_0 : i32, i32
  }
  func.func @transform_3(%arg0: i32, %arg1: i32, %arg2: memref<2xi32, #tpu.memory_space<smem>>) -> (i32, i32) {
    %c0_i32 = arith.constant 0 : i32
    %c0_i32_0 = arith.constant 0 : i32
    return %c0_i32, %arg0 : i32, i32
  }
}

</mosaic_0001>

<bundles_post_ra>
// kernel: tpu_custom_call.1
= control target key start
LH: loop header
LB: loop body
LE: loop exit
PB: predicated region body
PF: predicated region fallthrough
CT: control target
= control target key end

     0   :  { %s2342_s0 = inlined_call_operand.hbm [shape: s32[2], index: 0, kind: input, shape index: {}]   ;;  %s2343_s1 = inlined_call_operand.hbm [shape: f32[128,128], index: 1, kind: input, shape index: {}]   ;;  %s2344_s2 = inlined_call_operand.vmem [shape: s32[1,128], index: 2, kind: input, shape index: {}]   ;;  %s2345_s3 = inlined_call_operand.vmem [shape: f32[8,8], index: 3, kind: input, shape index: {}]   ;;  %s2346_s4 = inlined_call_operand.hbm [shape: f32[1,128], index: 4, kind: output, shape index: {}]  }
   0x1   :  { %s2038_s17 = scalar_lea.hbm %s2342_s0, 16 }
   0x2   :  { %p2039_p0 = scmp.ne.s32.totalorder %s2342_s0, %s2038_s17  ;;  %p2042_p1 = scmp.lt.u32.totalorder %s2038_s17, %s2342_s0 }
   0x4   :  { %p2044_p2 = pnand %p2042_p1, %p2039_p0 }
   0x6   :  { %2047 = shalt.err (!%p2044_p2)  }
   0x7   :  { %s2100_s22 = smov [#allocation7]  }
   0x8   :  { %10 = dma.hbm_to_smem %s2342_s0, 16, %s2100_s22, [#allocation6] }
   0x9   :  { %2094 = dma.done.wait [#allocation6], 16 }
   0xa   :  { %2095 = vsyncadd [#allocation6], 4294967280 }
   0xb   :  { %12 = sfence }
   0xc   :  { %13 = vsyncpa [#allocation9], 0 }
   0xd   :  { %14 = vsyncpa [#allocation10], 0  ;;  %s1813_s25 = sld [smem:[#allocation7 + $0x1]]  ;;  %s2101_s26 = smov [#allocation8]  }
   0xe   :  { %s25_s27 = sshll.u32 %s2101_s26, 4  ;;  %s2050_s8 = scalar_lea.hbm %s2343_s1, 2048  ;;  %s26_s27 = int_to_ptr.vmem [resolvable:$true] %s25_s27 }
  0x13   :  { %p1814_p3 = scmp.gt.s32.totalorder %s1813_s25, 0 }
  0x15   :  { %s2348_s25 = smov (%p1814_p3, %s1813_s25), 0 }
  0x16   :  { %s1815_s28 = sshll.u32 %s2348_s25, 7 }
  0x17   :  { %s24_s5 = scalar_lea.hbm %s2343_s1, %s1815_s28 }
  0x18   :  { %s2048_s6 = scalar_lea.hbm %s24_s5, 2048  ;;  %p2051_p5 = scmp.lt.u32.totalorder %s24_s5, %s2343_s1 }
  0x19   :  { %p2049_p4 = scmp.ne.s32.totalorder %s24_s5, %s2048_s6  ;;  %p2052_p6 = scmp.lt.u32.totalorder %s2050_s8, %s2048_s6 }
  0x1a   :  { %p2054_p8 = scmp.lt.u32.totalorder %s2048_s6, %s24_s5 }
  0x1b   :  { %p2053_p7 = por %p2052_p6, %p2051_p5 }
  0x1d   :  { %p2055_p9 = por %p2054_p8, %p2053_p7 }
  0x1f   :  { %p2056_p10 = pnand %p2055_p9, %p2049_p4 }
  0x21   :  { %2059 = shalt.err (!%p2056_p10)
}
  0x22   :  { %s2060_s11 = scalar_lea.vmem %s26_s27, 2048  ;;  %p2065_p12 = scmp.lt.s32.totalorder %s26_s27, %s26_s27 }
  0x23   :  { %p2061_p11 = scmp.ne.s32.totalorder %s26_s27, %s2060_s11  ;;  %p2066_p13 = scmp.lt.s32.totalorder %s2060_s11, %s2060_s11 }
  0x25   :  { %p2067_p0 = por %p2066_p13, %p2065_p12 }
  0x27   :  { %p2068_p1 = pnand %p2067_p0, %p2061_p11 }
  0x29   :  { %2071 = shalt.err (!%p2068_p1)
}
  0x2a   :  { %s2102_s12 = smov 128   ;;  %s2103_s13 = smov 8  }
  0x2b   :  { %31 = dma.hbm_to_vmem [thread:$0]  %s24_s5, 2048, %s26_s27, [#allocation9], %s2102_s12, %s2102_s12, %s2103_s13  }
  0x2c   :  { %2096 = dma.done.wait [#allocation9], 2048  }
  0x2d   :  { %2097 = vsyncadd [#allocation9], 4294965248  ;;  %v47_v0 = vlaneseq  ;;  %s42_s1 = sld [smem:[#allocation7]]  ;;  %v2104_v2 = vmov -10000.0   ;;  %vm53_vm1 = vcmask 64512   ;;  %v52_v4 = vld [vmem:[%s2345_s3] sm:$0xff] }
  0x2e   :  { %v54_v5 = vsel %vm53_vm1, %v52_v4, -inf  ;;  %vm57_vm2 = vcmask 7168  }
  0x2f   :  { %v2158_v1 = vshrl.u32 %v47_v0, 7  ;;  %55 = vmax.xlane.f32.xlu0 %v54_v5 }
  0x31   :  { %vm49_vm0 = vcmp.eq.s32.totalorder %v2158_v1, 6 }
  0x32   :  { %v50_v3 = vsel %vm49_vm0, 0.0, %v2104_v2 }
  0x33   :  { %51 = vst [vmem:[#allocation2] sm:$0xff] %v50_v3  ;;  %p1817_p2 = scmp.le.s32.totalorder %s42_s1, 0 }
  0x34   :  { %v2105_v12 = vmov (!%p1817_p2), 0.0   ;;  %vm2106_vm3 = vmmov (!%p1817_p2), 0   ;;  %v2107_v14 = vmov (!%p1817_p2), 0   ;;  %v68_v24 = vld [vmem:[#allocation8] sm:$0xff] (!%p1817_p2)  ;;  %v69_v25 = vld [vmem:[#allocation8 + $0x8] sm:$0xff] (!%p1817_p2)  ;;  %v70_v26 = vld [vmem:[#allocation8 + $0x10] sm:$0xff] (!%p1817_p2) }
  0x35   :  { %1869 = vmatprep.subr.mxu0 (!%p1817_p2), %v2105_v12  ;;  %1871 = vmatprep.mubr.msk.f32.mxu0 (!%p1817_p2), %vm2106_vm3, %v2105_v12  ;;  %v71_v27 = vld [vmem:[#allocation8 + $0x18] sm:$0xff] (!%p1817_p2)  ;;  %v72_v28 = vld [vmem:[#allocation8 + $0x20] sm:$0xff] (!%p1817_p2)  ;;  %v73_v29 = vld [vmem:[#allocation8 + $0x28] sm:$0xff] (!%p1817_p2)  ;;  %v2194_v46 = vsub.s32 (!%p1817_p2), 0, %v2158_v1 }
  0x36   :  { %1968 = vset.pattern.permute.xlu0 (!%p1817_p2), %v2107_v14  ;;  %1874 = vmatprep.subr.mxu1 (!%p1817_p2), %v2105_v12  ;;  %v74_v30 = vld [vmem:[#allocation8 + $0x30] sm:$0xff] (!%p1817_p2)  ;;  %v75_v31 = vld [vmem:[#allocation8 + $0x38] sm:$0xff] (!%p1817_p2)  ;;  %v76_v32 = vld [vmem:[#allocation8 + $0x40] sm:$0xff] (!%p1817_p2) }
  0x37   :  { %1876 = vmatprep.mubr.msk.f32.mxu1 (!%p1817_p2), %vm2106_vm3, %v2105_v12  ;;  %v77_v33 = vld [vmem:[#allocation8 + $0x48] sm:$0xff] (!%p1817_p2)  ;;  %v78_v34 = vld [vmem:[#allocation8 + $0x50] sm:$0xff] (!%p1817_p2)  ;;  %v79_v35 = vld [vmem:[#allocation8 + $0x58] sm:$0xff] (!%p1817_p2) }
  0x38   :  { %v80_v36 = vld [vmem:[#allocation8 + $0x60] sm:$0xff] (!%p1817_p2)  ;;  %v81_v37 = vld [vmem:[#allocation8 + $0x68] sm:$0xff] (!%p1817_p2)  ;;  %v82_v38 = vld [vmem:[#allocation8 + $0x70] sm:$0xff] (!%p1817_p2) }
  0x39   :  { %v83_v39 = vld [vmem:[#allocation8 + $0x78] sm:$0xff] (!%p1817_p2)  ;;  %v2190_v44 = vld [vmem:[%s2344_s2] sm:$0x1] (!%p1817_p2) }
  0x3a   :  { %v2166_v10 = vld [vmem:[#allocation2] sm:$0xff] (!%p1817_p2)  ;;  %vm232_vm4 = vcmp.gt.s32.totalorder (!%p1817_p2), %v2190_v44, 0  ;;  %vm329_vm6 = vcmp.gt.s32.totalorder (!%p1817_p2), %v2190_v44, 1  ;;  %vm426_vm8 = vcmp.gt.s32.totalorder (!%p1817_p2), %v2190_v44, 2  ;;  %vm523_vm10 = vcmp.gt.s32.totalorder (!%p1817_p2), %v2190_v44, 3 }
  0x3b   :  { %v142_v13 = vrot.slane (!%p1817_p2), %v2166_v10, 4  ;;  %v233_v47 = vsel (!%p1817_p2), %vm232_vm4, 1, %v2107_v14  ;;  %vm620_vm12 = vcmp.gt.s32.totalorder (!%p1817_p2), %v2190_v44, 4  ;;  %vm717_vm14 = vcmp.gt.s32.totalorder (!%p1817_p2), %v2190_v44, 5 }
  0x3c   :  { %v237_v49 = vrot.slane (!%p1817_p2), %v233_v47, %v2194_v46  ;;  %vm814_vm0 = vcmp.gt.s32.totalorder (!%p1817_p2), %v2190_v44, 6  ;;  %vm911_vm4 = vcmp.gt.s32.totalorder (!%p1817_p2), %v2190_v44, 7 }
  0x3d   :  { %v143_v15 = vmax.f32 (!%p1817_p2), %v2166_v10, %v142_v13 }
  0x3e   :  { %vm238_vm5 = vcmp.eq.s32.totalorder (!%p1817_p2), %v237_v49, 1 }
  0x3f   :  { %v144_v16 = vrot.slane (!%p1817_p2), %v143_v15, 2 }
  0x41   :  { %v145_v17 = vmax.f32 (!%p1817_p2), %v143_v15, %v144_v16 }
  0x43   :  { %v146_v18 = vrot.slane (!%p1817_p2), %v145_v17, 1 }
  0x45   :  { %v147_v19 = vmax.f32 (!%p1817_p2), %v145_v17, %v146_v18 }
  0x47   :  { %v148_v20 = vsub.f32 (!%p1817_p2), %v2166_v10, %v147_v19 }
  0x49   :  { %v149_v21 = vmul.f32 (!%p1817_p2), 1.442695, %v148_v20 }
  0xbc   :  { %v56_v6 = vpop.xlane.xlu0 %55 }
  0xbd   :  { %58 = vst.msk [vmem:[#allocation3] sm:$0xff] %vm57_vm2, %v56_v6  ;;  %v59_v7 = vsub.f32 %v52_v4, %v56_v6  ;;  %v330_v4 = vsel (!%p1817_p2), %vm329_vm6, 1, %v2107_v14  ;;  %vm1008_vm6 = vcmp.gt.s32.totalorder (!%p1817_p2), %v2190_v44, 8 }
  0xbe   :  { %v334_v6 = vrot.slane (!%p1817_p2), %v330_v4, %v2194_v46 }
  0xbf   :  { %v60_v8 = vmul.f32 1.442695, %v59_v7 }
  0xc0   :  { %vm335_vm7 = vcmp.eq.s32.totalorder (!%p1817_p2), %v334_v6, 1 }
  0xc1   :  { %1966 = vpow2.f32 %v60_v8 }
  0xc2   :  { %1969 = vpow2.f32 (!%p1817_p2), %v149_v21 }
  0xc4   :  { %v133_v11 = vld [vmem:[#allocation3] sm:$0xff] (!%p1817_p2) }
  0xc5   :  { %136 = vperm.xlu0 (!%p1817_p2), %1968, %v133_v11  }
  0xc6   :  { %67 = sbr.rel (%p1817_p2) target bundleno = 4313 (0x10d9), region = 25 }
  0xcb   :  { %v1967_v9 = vpop.eup %1966 }
  0xcc   :  { %62 = vst.msk [vmem:[#allocation4] sm:$0xff] %vm53_vm1, %v1967_v9  ;;  %v1970_v23 = vpop.eup (!%p1817_p2), %1969 }
  0xcd   :  { %1870 = vmatpush3.msra.mxu0 %v1970_v23 }
  0xce   :  { %1879 = vmatprep.subr.mxu0 %v2105_v12 }
  0xd3   :  { %v2178_v22 = vld [vmem:[#allocation4] sm:$0xff] }
  0xd4   :  { %1872 = vmatmul.mubr.msk.f32.vlgmr.msra.gmra.mrb[0].mxu0 %vm53_vm1, %v2178_v22 }
  0xd5   :  { %1881 = vmatprep.mubr.msk.f32.mxu0 %vm2106_vm3, %v2105_v12 }
  0xe3   :  { %84 = vxpose.xlu0.b32.start [1/16] %v68_v24, 128 }
  0xe7   :  { %85 = vxpose.xlu0.b32.cont [2/16] %v69_v25, 128 }
  0xeb   :  { %86 = vxpose.xlu0.b32.cont [3/16] %v70_v26, 128 }
  0xef   :  { %87 = vxpose.xlu0.b32.cont [4/16] %v71_v27, 128 }
  0xf3   :  { %88 = vxpose.xlu0.b32.cont [5/16] %v72_v28, 128  ;;  %v427_v28 = vsel %vm426_vm8, 1, %v2107_v14  ;;  %vm1105_vm8 = vcmp.gt.s32.totalorder %v2190_v44, 9 }
  0xf7   :  { %89 = vxpose.xlu0.b32.cont [6/16] %v73_v29, 128 }
  0xfb   :  { %90 = vxpose.xlu0.b32.cont [7/16] %v74_v30, 128  ;;  %v431_v30 = vrot.slane %v427_v28, %v2194_v46 }
  0xfd   :  { %vm432_vm9 = vcmp.eq.s32.totalorder %v431_v30, 1 }
  0xff   :  { %91 = vxpose.xlu0.b32.cont [8/16] %v75_v31, 128 }
 0x103   :  { %92 = vxpose.xlu0.b32.cont [9/16] %v76_v32, 128 }
 0x107   :  { %93 = vxpose.xlu0.b32.cont [10/16] %v77_v33, 128 }
 0x10b   :  { %94 = vxpose.xlu0.b32.cont [11/16] %v78_v34, 128 }
 0x10f   :  { %95 = vxpose.xlu0.b32.cont [12/16] %v79_v35, 128 }
 0x113   :  { %96 = vxpose.xlu0.b32.cont [13/16] %v80_v36, 128 }
 0x117   :  { %97 = vxpose.xlu0.b32.cont [14/16] %v81_v37, 128 }
 0x11b   :  { %98 = vxpose.xlu0.b32.cont [15/16] %v82_v38, 128 }
 0x11f   :  { %99 = vxpose.xlu0.b32.end [16/16] %v83_v39, 128 }
 0x144   :  { %v2185_v41 = vpop.permute.xlu0 %136 }
 0x163   :  { %v100_v45 = vpop.trf.xlu0 }
 0x164   :  { %v226_v48 = vadd.f32 %v147_v19, %v100_v45 }
 0x166   :  { %v227_v51 = vadd.f32 %v226_v48, %v2185_v41 }
 0x167   :  { %v101_v3 = vpop.trf.xlu0 }
 0x16b   :  { %v102_v27 = vpop.trf.xlu0 }
 0x1a7   :  { %v221_v40 = vpop.f32.mrb[0].mxu0 }
 0x1a8   :  { %v225_v42 = vmax.f32 %v221_v40, 1e-37  ;;  %v1873_v43 = vpop.f32.mrb[1].mxu0 }
 0x1aa   :  { %1971 = vlog2.f32 %v225_v42 }
 0x1b4   :  { %v1972_v50 = vpop.eup %1971 }
 0x1b5   :  { %v229_v52 = vmul.f32 0.6931472, %v1972_v50 }
 0x1b7   :  { %v230_v53 = vadd.f32 %v229_v52, %v227_v51  ;;  %v103_v51 = vpop.trf.xlu0  ;;  %v524_v52 = vsel %vm523_vm10, 1, %v2107_v14  ;;  %vm1202_vm10 = vcmp.gt.s32.totalorder %v2190_v44, 10 }
 0x1b9   :  { %v239_v54 = vsel %vm238_vm5, %v230_v53, %v2166_v10 }
 0x1ba   :  { %v242_v55 = vrot.slane %v239_v54, 4 }
 0x1bc   :  { %v243_v56 = vmax.f32 %v239_v54, %v242_v55 }
 0x1be   :  { %v244_v57 = vrot.slane %v243_v56, 2 }
 0x1c0   :  { %v245_v58 = vmax.f32 %v243_v56, %v244_v57 }
 0x1c2   :  { %v246_v59 = vrot.slane %v245_v58, 1 }
 0x1c4   :  { %v247_v60 = vmax.f32 %v245_v58, %v246_v59 }
 0x1c6   :  { %v248_v61 = vsub.f32 %v239_v54, %v247_v60  ;;  %v322_v5 = vadd.f32 %v247_v60, %v101_v3 }
 0x1c8   :  { %v249_v62 = vmul.f32 1.442695, %v248_v61  ;;  %v323_v8 = vadd.f32 %v322_v5, %v2185_v41 }
 0x1ca   :  { %1973 = vpow2.f32 %v249_v62 }
 0x1d4   :  { %v1974_v63 = vpop.eup %1973 }
 0x1d5   :  { %1875 = vmatpush3.msra.mxu1 %v1974_v63 }
 0x1d6   :  { %1877 = vmatmul.mubr.msk.f32.vlgmr.msra.gmra.mrb[0].mxu1 %vm53_vm1, %v2178_v22  ;;  %1884 = vmatprep.subr.mxu1 %v2105_v12 }
 0x1d7   :  { %1886 = vmatprep.mubr.msk.f32.mxu1 %vm2106_vm3, %v2105_v12 }
 0x2a9   :  { %v317_v0 = vpop.f32.mrb[0].mxu1 }
 0x2aa   :  { %v321_v1 = vmax.f32 %v317_v0, 1e-37  ;;  %v1878_v2 = vpop.f32.mrb[1].mxu1 }
 0x2ac   :  { %1975 = vlog2.f32 %v321_v1 }
 0x2b6   :  { %v1976_v7 = vpop.eup %1975 }
 0x2b7   :  { %v325_v9 = vmul.f32 0.6931472, %v1976_v7 }
 0x2b9   :  { %v326_v10 = vadd.f32 %v325_v9, %v323_v8  ;;  %v104_v8 = vpop.trf.xlu0  ;;  %v621_v9 = vsel %vm620_vm12, 1, %v2107_v14  ;;  %vm1299_vm12 = vcmp.gt.s32.totalorder %v2190_v44, 11 }
 0x2bb   :  { %v336_v11 = vsel %vm335_vm7, %v326_v10, %v239_v54  ;;  %v528_v54 = vrot.slane %v524_v52, %v2194_v46 }
 0x2bc   :  { %v339_v13 = vrot.slane %v336_v11, 4 }
 0x2bd   :  { %vm529_vm11 = vcmp.eq.s32.totalorder %v528_v54, 1 }
 0x2be   :  { %v340_v15 = vmax.f32 %v336_v11, %v339_v13 }
 0x2c0   :  { %v341_v16 = vrot.slane %v340_v15, 2 }
 0x2c2   :  { %v342_v17 = vmax.f32 %v340_v15, %v341_v16 }
 0x2c4   :  { %v343_v18 = vrot.slane %v342_v17, 1 }
 0x2c6   :  { %v344_v19 = vmax.f32 %v342_v17, %v343_v18 }
 0x2c8   :  { %v345_v20 = vsub.f32 %v336_v11, %v344_v19  ;;  %v419_v29 = vadd.f32 %v344_v19, %v102_v27 }
 0x2ca   :  { %v346_v21 = vmul.f32 1.442695, %v345_v20  ;;  %v420_v32 = vadd.f32 %v419_v29, %v2185_v41 }
 0x2cc   :  { %1977 = vpow2.f32 %v346_v21 }
 0x2d6   :  { %v1978_v23 = vpop.eup %1977 }
 0x2d7   :  { %1880 = vmatpush3.msra.mxu0 %v1978_v23 }
 0x2d8   :  { %1882 = vmatmul.mubr.msk.f32.vlgmr.msra.gmra.mrb[2].mxu0 %vm53_vm1, %v2178_v22  ;;  %1889 = vmatprep.subr.mxu0 %v2105_v12 }
 0x2d9   :  { %1891 = vmatprep.mubr.msk.f32.mxu0 %vm2106_vm3, %v2105_v12 }
 0x3ab   :  { %v414_v24 = vpop.f32.mrb[2].mxu0 }
 0x3ac   :  { %v418_v25 = vmax.f32 %v414_v24, 1e-37  ;;  %v1883_v26 = vpop.f32.mrb[3].mxu0 }
 0x3ae   :  { %1979 = vlog2.f32 %v418_v25 }
 0x3b8   :  { %v1980_v31 = vpop.eup %1979 }
 0x3b9   :  { %v422_v33 = vmul.f32 0.6931472, %v1980_v31 }
 0x3bb   :  { %v423_v34 = vadd.f32 %v422_v33, %v420_v32  ;;  %v105_v32 = vpop.trf.xlu0  ;;  %v718_v33 = vsel %vm717_vm14, 1, %v2107_v14  ;;  %vm1396_vm14 = vcmp.gt.s32.totalorder %v2190_v44, 12 }
 0x3bd   :  { %v433_v35 = vsel %vm432_vm9, %v423_v34, %v336_v11  ;;  %v625_v11 = vrot.slane %v621_v9, %v2194_v46 }
 0x3be   :  { %v436_v36 = vrot.slane %v433_v35, 4 }
 0x3bf   :  { %vm626_vm13 = vcmp.eq.s32.totalorder %v625_v11, 1 }
 0x3c0   :  { %v437_v37 = vmax.f32 %v433_v35, %v436_v36 }
 0x3c2   :  { %v438_v38 = vrot.slane %v437_v37, 2 }
 0x3c4   :  { %v439_v39 = vmax.f32 %v437_v37, %v438_v38 }
 0x3c6   :  { %v440_v40 = vrot.slane %v439_v39, 1 }
 0x3c8   :  { %v441_v42 = vmax.f32 %v439_v39, %v440_v40 }
 0x3ca   :  { %v442_v43 = vsub.f32 %v433_v35, %v441_v42  ;;  %v516_v53 = vadd.f32 %v441_v42, %v103_v51 }
 0x3cc   :  { %v443_v45 = vmul.f32 1.442695, %v442_v43  ;;  %v517_v56 = vadd.f32 %v516_v53, %v2185_v41 }
 0x3ce   :  { %1981 = vpow2.f32 %v443_v45 }
 0x3d8   :  { %v1982_v47 = vpop.eup %1981 }
 0x3d9   :  { %1885 = vmatpush3.msra.mxu1 %v1982_v47 }
 0x3da   :  { %1887 = vmatmul.mubr.msk.f32.vlgmr.msra.gmra.mrb[2].mxu1 %vm53_vm1, %v2178_v22  ;;  %1894 = vmatprep.subr.mxu1 %v2105_v12 }
 0x3db   :  { %1896 = vmatprep.mubr.msk.f32.mxu1 %vm2106_vm3, %v2105_v12 }
 0x4ad   :  { %v511_v48 = vpop.f32.mrb[2].mxu1 }
 0x4ae   :  { %v515_v49 = vmax.f32 %v511_v48, 1e-37  ;;  %v1888_v50 = vpop.f32.mrb[3].mxu1 }
 0x4b0   :  { %1983 = vlog2.f32 %v515_v49 }
 0x4ba   :  { %v1984_v55 = vpop.eup %1983 }
 0x4bb   :  { %v519_v57 = vmul.f32 0.6931472, %v1984_v55 }
 0x4bd   :  { %v520_v58 = vadd.f32 %v519_v57, %v517_v56  ;;  %v106_v56 = vpop.trf.xlu0  ;;  %v815_v57 = vsel %vm814_vm0, 1, %v2107_v14  ;;  %vm1493_vm0 = vcmp.gt.s32.totalorder %v2190_v44, 13 }
 0x4bf   :  { %v530_v59 = vsel %vm529_vm11, %v520_v58, %v433_v35  ;;  %v722_v35 = vrot.slane %v718_v33, %v2194_v46 }
 0x4c0   :  { %v533_v60 = vrot.slane %v530_v59, 4 }
 0x4c1   :  { %vm723_vm15 = vcmp.eq.s32.totalorder %v722_v35, 1 }
 0x4c2   :  { %v534_v61 = vmax.f32 %v530_v59, %v533_v60 }
 0x4c4   :  { %v535_v62 = vrot.slane %v534_v61, 2 }
 0x4c6   :  { %v536_v63 = vmax.f32 %v534_v61, %v535_v62 }
 0x4c8   :  { %v537_v0 = vrot.slane %v536_v63, 1 }
 0x4ca   :  { %v538_v1 = vmax.f32 %v536_v63, %v537_v0 }
 0x4cc   :  { %v539_v2 = vsub.f32 %v530_v59, %v538_v1  ;;  %v613_v10 = vadd.f32 %v538_v1, %v104_v8 }
 0x4ce   :  { %v540_v3 = vmul.f32 1.442695, %v539_v2  ;;  %v614_v15 = vadd.f32 %v613_v10, %v2185_v41 }
 0x4d0   :  { %1985 = vpow2.f32 %v540_v3 }
 0x4da   :  { %v1986_v4 = vpop.eup %1985 }
 0x4db   :  { %1890 = vmatpush3.msra.mxu0 %v1986_v4 }
 0x4dc   :  { %1892 = vmatmul.mubr.msk.f32.vlgmr.msra.gmra.mrb[4].mxu0 %vm53_vm1, %v2178_v22  ;;  %1899 = vmatprep.subr.mxu0 %v2105_v12 }
 0x4dd   :  { %1901 = vmatprep.mubr.msk.f32.mxu0 %vm2106_vm3, %v2105_v12 }
 0x5af   :  { %v608_v5 = vpop.f32.mrb[4].mxu0 }
 0x5b0   :  { %v612_v6 = vmax.f32 %v608_v5, 1e-37  ;;  %v1893_v7 = vpop.f32.mrb[5].mxu0 }
 0x5b2   :  { %1987 = vlog2.f32 %v612_v6 }
 0x5bc   :  { %v1988_v13 = vpop.eup %1987 }
 0x5bd   :  { %v616_v16 = vmul.f32 0.6931472, %v1988_v13 }
 0x5bf   :  { %v617_v17 = vadd.f32 %v616_v16, %v614_v15  ;;  %v107_v15 = vpop.trf.xlu0  ;;  %v912_v16 = vsel %vm911_vm4, 1, %v2107_v14 }
 0x5c1   :  { %v627_v18 = vsel %vm626_vm13, %v617_v17, %v530_v59  ;;  %v819_v59 = vrot.slane %v815_v57, %v2194_v46 }
 0x5c2   :  { %v630_v19 = vrot.slane %v627_v18, 4 }
 0x5c3   :  { %vm820_vm2 = vcmp.eq.s32.totalorder %v819_v59, 1 }
 0x5c4   :  { %v631_v20 = vmax.f32 %v627_v18, %v630_v19 }
 0x5c6   :  { %v632_v21 = vrot.slane %v631_v20, 2 }
 0x5c8   :  { %v633_v23 = vmax.f32 %v631_v20, %v632_v21 }
 0x5ca   :  { %v634_v24 = vrot.slane %v633_v23, 1 }
 0x5cc   :  { %v635_v25 = vmax.f32 %v633_v23, %v634_v24 }
 0x5ce   :  { %v636_v26 = vsub.f32 %v627_v18, %v635_v25  ;;  %v710_v34 = vadd.f32 %v635_v25, %v105_v32 }
 0x5d0   :  { %v637_v27 = vmul.f32 1.442695, %v636_v26  ;;  %v711_v37 = vadd.f32 %v710_v34, %v2185_v41 }
 0x5d2   :  { %1989 = vpow2.f32 %v637_v27 }
 0x5dc   :  { %v1990_v28 = vpop.eup %1989 }
 0x5dd   :  { %1895 = vmatpush3.msra.mxu1 %v1990_v28 }
 0x5de   :  { %1897 = vmatmul.mubr.msk.f32.vlgmr.msra.gmra.mrb[4].mxu1 %vm53_vm1, %v2178_v22  ;;  %1904 = vmatprep.subr.mxu1 %v2105_v12 }
 0x5df   :  { %1906 = vmatprep.mubr.msk.f32.mxu1 %vm2106_vm3, %v2105_v12 }
 0x6b1   :  { %v705_v29 = vpop.f32.mrb[4].mxu1 }
 0x6b2   :  { %v709_v30 = vmax.f32 %v705_v29, 1e-37  ;;  %v1898_v31 = vpop.f32.mrb[5].mxu1 }
 0x6b4   :  { %1991 = vlog2.f32 %v709_v30 }
 0x6be   :  { %v1992_v36 = vpop.eup %1991 }
 0x6bf   :  { %v713_v38 = vmul.f32 0.6931472, %v1992_v36 }
 0x6c1   :  { %v714_v39 = vadd.f32 %v713_v38, %v711_v37  ;;  %v108_v37 = vpop.trf.xlu0  ;;  %v1009_v38 = vsel %vm1008_vm6, 1, %v2107_v14 }
 0x6c3   :  { %v724_v40 = vsel %vm723_vm15, %v714_v39, %v627_v18  ;;  %v916_v18 = vrot.slane %v912_v16, %v2194_v46 }
 0x6c4   :  { %v727_v42 = vrot.slane %v724_v40, 4 }
 0x6c5   :  { %vm917_vm5 = vcmp.eq.s32.totalorder %v916_v18, 1 }
 0x6c6   :  { %v728_v43 = vmax.f32 %v724_v40, %v727_v42 }
 0x6c8   :  { %v729_v45 = vrot.slane %v728_v43, 2 }
 0x6ca   :  { %v730_v47 = vmax.f32 %v728_v43, %v729_v45 }
 0x6cc   :  { %v731_v48 = vrot.slane %v730_v47, 1 }
 0x6ce   :  { %v732_v49 = vmax.f32 %v730_v47, %v731_v48 }
 0x6d0   :  { %v733_v50 = vsub.f32 %v724_v40, %v732_v49  ;;  %v807_v58 = vadd.f32 %v732_v49, %v106_v56 }
 0x6d2   :  { %v734_v51 = vmul.f32 1.442695, %v733_v50  ;;  %v808_v61 = vadd.f32 %v807_v58, %v2185_v41 }
 0x6d4   :  { %1993 = vpow2.f32 %v734_v51 }
 0x6de   :  { %v1994_v52 = vpop.eup %1993 }
 0x6df   :  { %1900 = vmatpush3.msra.mxu0 %v1994_v52 }
 0x6e0   :  { %1902 = vmatmul.mubr.msk.f32.vlgmr.msra.gmra.mrb[6].mxu0 %vm53_vm1, %v2178_v22  ;;  %1909 = vmatprep.subr.mxu0 %v2105_v12 }
 0x6e1   :  { %1911 = vmatprep.mubr.msk.f32.mxu0 %vm2106_vm3, %v2105_v12 }
 0x7b3   :  { %v802_v53 = vpop.f32.mrb[6].mxu0 }
 0x7b4   :  { %v806_v54 = vmax.f32 %v802_v53, 1e-37  ;;  %v1903_v55 = vpop.f32.mrb[7].mxu0 }
 0x7b6   :  { %1995 = vlog2.f32 %v806_v54 }
 0x7c0   :  { %v1996_v60 = vpop.eup %1995 }
 0x7c1   :  { %v810_v62 = vmul.f32 0.6931472, %v1996_v60 }
 0x7c3   :  { %v811_v63 = vadd.f32 %v810_v62, %v808_v61  ;;  %v109_v61 = vpop.trf.xlu0  ;;  %v1106_v62 = vsel %vm1105_vm8, 1, %v2107_v14 }
 0x7c5   :  { %v821_v0 = vsel %vm820_vm2, %v811_v63, %v724_v40  ;;  %v1013_v40 = vrot.slane %v1009_v38, %v2194_v46 }
 0x7c6   :  { %v824_v1 = vrot.slane %v821_v0, 4 }
 0x7c7   :  { %vm1014_vm7 = vcmp.eq.s32.totalorder %v1013_v40, 1 }
 0x7c8   :  { %v825_v2 = vmax.f32 %v821_v0, %v824_v1 }
 0x7ca   :  { %v826_v3 = vrot.slane %v825_v2, 2 }
 0x7cc   :  { %v827_v4 = vmax.f32 %v825_v2, %v826_v3 }
 0x7ce   :  { %v828_v5 = vrot.slane %v827_v4, 1 }
 0x7d0   :  { %v829_v6 = vmax.f32 %v827_v4, %v828_v5 }
 0x7d2   :  { %v830_v7 = vsub.f32 %v821_v0, %v829_v6  ;;  %v904_v17 = vadd.f32 %v829_v6, %v107_v15 }
 0x7d4   :  { %v831_v8 = vmul.f32 1.442695, %v830_v7  ;;  %v905_v20 = vadd.f32 %v904_v17, %v2185_v41 }
 0x7d6   :  { %1997 = vpow2.f32 %v831_v8 }
 0x7e0   :  { %v1998_v9 = vpop.eup %1997 }
 0x7e1   :  { %1905 = vmatpush3.msra.mxu1 %v1998_v9 }
 0x7e2   :  { %1907 = vmatmul.mubr.msk.f32.vlgmr.msra.gmra.mrb[6].mxu1 %vm53_vm1, %v2178_v22  ;;  %1914 = vmatprep.subr.mxu1 %v2105_v12 }
 0x7e3   :  { %1916 = vmatprep.mubr.msk.f32.mxu1 %vm2106_vm3, %v2105_v12 }
 0x8b5   :  { %v899_v10 = vpop.f32.mrb[6].mxu1 }
 0x8b6   :  { %v903_v11 = vmax.f32 %v899_v10, 1e-37  ;;  %v1908_v13 = vpop.f32.mrb[7].mxu1 }
 0x8b8   :  { %1999 = vlog2.f32 %v903_v11 }
 0x8c2   :  { %v2000_v19 = vpop.eup %1999 }
 0x8c3   :  { %v907_v21 = vmul.f32 0.6931472, %v2000_v19 }
 0x8c5   :  { %v908_v23 = vadd.f32 %v907_v21, %v905_v20  ;;  %v110_v20 = vpop.trf.xlu0  ;;  %v1203_v21 = vsel %vm1202_vm10, 1, %v2107_v14 }
 0x8c7   :  { %v918_v24 = vsel %vm917_vm5, %v908_v23, %v821_v0  ;;  %v1110_v0 = vrot.slane %v1106_v62, %v2194_v46  ;;  %vm1687_vm5 = vcmp.gt.s32.totalorder %v2190_v44, 15 }
 0x8c8   :  { %v921_v25 = vrot.slane %v918_v24, 4 }
 0x8c9   :  { %vm1111_vm9 = vcmp.eq.s32.totalorder %v1110_v0, 1 }
 0x8ca   :  { %v922_v26 = vmax.f32 %v918_v24, %v921_v25 }
 0x8cc   :  { %v923_v27 = vrot.slane %v922_v26, 2 }
 0x8ce   :  { %v924_v28 = vmax.f32 %v922_v26, %v923_v27 }
 0x8d0   :  { %v925_v29 = vrot.slane %v924_v28, 1 }
 0x8d2   :  { %v926_v30 = vmax.f32 %v924_v28, %v925_v29 }
 0x8d4   :  { %v927_v31 = vsub.f32 %v918_v24, %v926_v30  ;;  %v1001_v39 = vadd.f32 %v926_v30, %v108_v37 }
 0x8d6   :  { %v928_v32 = vmul.f32 1.442695, %v927_v31  ;;  %v1002_v43 = vadd.f32 %v1001_v39, %v2185_v41 }
 0x8d8   :  { %2001 = vpow2.f32 %v928_v32 }
 0x8e2   :  { %v2002_v33 = vpop.eup %2001 }
 0x8e3   :  { %1910 = vmatpush3.msra.mxu0 %v2002_v33 }
 0x8e4   :  { %1912 = vmatmul.mubr.msk.f32.vlgmr.msra.gmra.mrb[8].mxu0 %vm53_vm1, %v2178_v22  ;;  %1919 = vmatprep.subr.mxu0 %v2105_v12 }
 0x8e5   :  { %1921 = vmatprep.mubr.msk.f32.mxu0 %vm2106_vm3, %v2105_v12 }
 0x9b7   :  { %v996_v34 = vpop.f32.mrb[8].mxu0 }
 0x9b8   :  { %v1000_v35 = vmax.f32 %v996_v34, 1e-37  ;;  %v1913_v36 = vpop.f32.mrb[9].mxu0 }
 0x9ba   :  { %2003 = vlog2.f32 %v1000_v35 }
 0x9c4   :  { %v2004_v42 = vpop.eup %2003 }
 0x9c5   :  { %v1004_v45 = vmul.f32 0.6931472, %v2004_v42 }
 0x9c7   :  { %v1005_v47 = vadd.f32 %v1004_v45, %v1002_v43  ;;  %v111_v43 = vpop.trf.xlu0  ;;  %v1300_v45 = vsel %vm1299_vm12, 1, %v2107_v14 }
 0x9c9   :  { %v1015_v48 = vsel %vm1014_vm7, %v1005_v47, %v918_v24  ;;  %v1207_v24 = vrot.slane %v1203_v21, %v2194_v46 }
 0x9ca   :  { %v1018_v49 = vrot.slane %v1015_v48, 4 }
 0x9cb   :  { %vm1208_vm11 = vcmp.eq.s32.totalorder %v1207_v24, 1 }
 0x9cc   :  { %v1019_v50 = vmax.f32 %v1015_v48, %v1018_v49 }
 0x9ce   :  { %v1020_v51 = vrot.slane %v1019_v50, 2 }
 0x9d0   :  { %v1021_v52 = vmax.f32 %v1019_v50, %v1020_v51 }
 0x9d2   :  { %v1022_v53 = vrot.slane %v1021_v52, 1 }
 0x9d4   :  { %v1023_v54 = vmax.f32 %v1021_v52, %v1022_v53 }
 0x9d6   :  { %v1024_v55 = vsub.f32 %v1015_v48, %v1023_v54  ;;  %v1098_v63 = vadd.f32 %v1023_v54, %v109_v61 }
 0x9d8   :  { %v1025_v56 = vmul.f32 1.442695, %v1024_v55  ;;  %v1099_v2 = vadd.f32 %v1098_v63, %v2185_v41 }
 0x9da   :  { %2005 = vpow2.f32 %v1025_v56 }
 0x9e4   :  { %v2006_v57 = vpop.eup %2005 }
 0x9e5   :  { %1915 = vmatpush3.msra.mxu1 %v2006_v57 }
 0x9e6   :  { %1917 = vmatmul.mubr.msk.f32.vlgmr.msra.gmra.mrb[8].mxu1 %vm53_vm1, %v2178_v22  ;;  %1924 = vmatprep.subr.mxu1 %v2105_v12 }
 0x9e7   :  { %1926 = vmatprep.mubr.msk.f32.mxu1 %vm2106_vm3, %v2105_v12 }
 0xab9   :  { %v1093_v58 = vpop.f32.mrb[8].mxu1 }
 0xaba   :  { %v1097_v59 = vmax.f32 %v1093_v58, 1e-37  ;;  %v1918_v60 = vpop.f32.mrb[9].mxu1 }
 0xabc   :  { %2007 = vlog2.f32 %v1097_v59 }
 0xac6   :  { %v2008_v1 = vpop.eup %2007 }
 0xac7   :  { %v1101_v3 = vmul.f32 0.6931472, %v2008_v1 }
 0xac9   :  { %v1102_v4 = vadd.f32 %v1101_v3, %v1099_v2  ;;  %v112_v2 = vpop.trf.xlu0  ;;  %v1397_v3 = vsel %vm1396_vm14, 1, %v2107_v14 }
 0xacb   :  { %v1112_v5 = vsel %vm1111_vm9, %v1102_v4, %v1015_v48  ;;  %v1304_v48 = vrot.slane %v1300_v45, %v2194_v46 }
 0xacc   :  { %v1115_v6 = vrot.slane %v1112_v5, 4 }
 0xacd   :  { %vm1305_vm13 = vcmp.eq.s32.totalorder %v1304_v48, 1 }
 0xace   :  { %v1116_v7 = vmax.f32 %v1112_v5, %v1115_v6 }
 0xad0   :  { %v1117_v8 = vrot.slane %v1116_v7, 2 }
 0xad2   :  { %v1118_v9 = vmax.f32 %v1116_v7, %v1117_v8 }
 0xad4   :  { %v1119_v10 = vrot.slane %v1118_v9, 1 }
 0xad6   :  { %v1120_v11 = vmax.f32 %v1118_v9, %v1119_v10 }
 0xad8   :  { %v1121_v13 = vsub.f32 %v1112_v5, %v1120_v11  ;;  %v1195_v23 = vadd.f32 %v1120_v11, %v110_v20 }
 0xada   :  { %v1122_v15 = vmul.f32 1.442695, %v1121_v13  ;;  %v1196_v26 = vadd.f32 %v1195_v23, %v2185_v41 }
 0xadc   :  { %2009 = vpow2.f32 %v1122_v15 }
 0xae6   :  { %v2010_v16 = vpop.eup %2009 }
 0xae7   :  { %1920 = vmatpush3.msra.mxu0 %v2010_v16 }
 0xae8   :  { %1922 = vmatmul.mubr.msk.f32.vlgmr.msra.gmra.mrb[10].mxu0 %vm53_vm1, %v2178_v22  ;;  %1929 = vmatprep.subr.mxu0 %v2105_v12 }
 0xae9   :  { %1931 = vmatprep.mubr.msk.f32.mxu0 %vm2106_vm3, %v2105_v12 }
 0xbbb   :  { %v1190_v17 = vpop.f32.mrb[10].mxu0 }
 0xbbc   :  { %v1194_v18 = vmax.f32 %v1190_v17, 1e-37  ;;  %v1923_v19 = vpop.f32.mrb[11].mxu0 }
 0xbbe   :  { %2011 = vlog2.f32 %v1194_v18 }
 0xbc8   :  { %v2012_v25 = vpop.eup %2011 }
 0xbc9   :  { %v1198_v27 = vmul.f32 0.6931472, %v2012_v25 }
 0xbcb   :  { %v1199_v28 = vadd.f32 %v1198_v27, %v1196_v26  ;;  %v113_v26 = vpop.trf.xlu0  ;;  %v1494_v27 = vsel %vm1493_vm0, 1, %v2107_v14 }
 0xbcd   :  { %v1209_v29 = vsel %vm1208_vm11, %v1199_v28, %v1112_v5  ;;  %v1401_v5 = vrot.slane %v1397_v3, %v2194_v46 }
 0xbce   :  { %v1212_v30 = vrot.slane %v1209_v29, 4 }
 0xbcf   :  { %vm1402_vm15 = vcmp.eq.s32.totalorder %v1401_v5, 1 }
 0xbd0   :  { %v1213_v31 = vmax.f32 %v1209_v29, %v1212_v30 }
 0xbd2   :  { %v1214_v32 = vrot.slane %v1213_v31, 2 }
 0xbd4   :  { %v1215_v33 = vmax.f32 %v1213_v31, %v1214_v32 }
 0xbd6   :  { %v1216_v34 = vrot.slane %v1215_v33, 1 }
 0xbd8   :  { %v1217_v35 = vmax.f32 %v1215_v33, %v1216_v34 }
 0xbda   :  { %v1218_v36 = vsub.f32 %v1209_v29, %v1217_v35  ;;  %v1292_v47 = vadd.f32 %v1217_v35, %v111_v43 }
 0xbdc   :  { %v1219_v37 = vmul.f32 1.442695, %v1218_v36  ;;  %v1293_v50 = vadd.f32 %v1292_v47, %v2185_v41 }
 0xbde   :  { %2013 = vpow2.f32 %v1219_v37 }
 0xbe8   :  { %v2014_v38 = vpop.eup %2013 }
 0xbe9   :  { %1925 = vmatpush3.msra.mxu1 %v2014_v38 }
 0xbea   :  { %1927 = vmatmul.mubr.msk.f32.vlgmr.msra.gmra.mrb[10].mxu1 %vm53_vm1, %v2178_v22  ;;  %1934 = vmatprep.subr.mxu1 %v2105_v12 }
 0xbeb   :  { %1936 = vmatprep.mubr.msk.f32.mxu1 %vm2106_vm3, %v2105_v12 }
 0xcbd   :  { %v1287_v39 = vpop.f32.mrb[10].mxu1 }
 0xcbe   :  { %v1291_v40 = vmax.f32 %v1287_v39, 1e-37  ;;  %v1928_v42 = vpop.f32.mrb[11].mxu1 }
 0xcc0   :  { %2015 = vlog2.f32 %v1291_v40 }
 0xcca   :  { %v2016_v49 = vpop.eup %2015 }
 0xccb   :  { %v1295_v51 = vmul.f32 0.6931472, %v2016_v49  ;;  %v114_v49 = vpop.trf.xlu0 }
 0xccd   :  { %v1296_v52 = vadd.f32 %v1295_v51, %v1293_v50 }
 0xccf   :  { %v1306_v53 = vsel %vm1305_vm13, %v1296_v52, %v1209_v29  ;;  %v1498_v29 = vrot.slane %v1494_v27, %v2194_v46 }
 0xcd0   :  { %v1309_v54 = vrot.slane %v1306_v53, 4 }
 0xcd1   :  { %vm1499_vm2 = vcmp.eq.s32.totalorder %v1498_v29, 1 }
 0xcd2   :  { %v1310_v55 = vmax.f32 %v1306_v53, %v1309_v54 }
 0xcd4   :  { %v1311_v56 = vrot.slane %v1310_v55, 2 }
 0xcd6   :  { %v1312_v57 = vmax.f32 %v1310_v55, %v1311_v56 }
 0xcd8   :  { %v1313_v58 = vrot.slane %v1312_v57, 1 }
 0xcda   :  { %v1314_v59 = vmax.f32 %v1312_v57, %v1313_v58 }
 0xcdc   :  { %v1315_v60 = vsub.f32 %v1306_v53, %v1314_v59  ;;  %v1389_v4 = vadd.f32 %v1314_v59, %v112_v2 }
 0xcde   :  { %v1316_v61 = vmul.f32 1.442695, %v1315_v60  ;;  %v1390_v7 = vadd.f32 %v1389_v4, %v2185_v41 }
 0xce0   :  { %2017 = vpow2.f32 %v1316_v61 }
 0xcea   :  { %v2018_v62 = vpop.eup %2017 }
 0xceb   :  { %1930 = vmatpush3.msra.mxu0 %v2018_v62 }
 0xcec   :  { %1932 = vmatmul.mubr.msk.f32.vlgmr.msra.gmra.mrb[12].mxu0 %vm53_vm1, %v2178_v22  ;;  %1939 = vmatprep.subr.mxu0 %v2105_v12 }
 0xced   :  { %1941 = vmatprep.mubr.msk.f32.mxu0 %vm2106_vm3, %v2105_v12 }
 0xdbf   :  { %v1384_v63 = vpop.f32.mrb[12].mxu0 }
 0xdc0   :  { %v1388_v0 = vmax.f32 %v1384_v63, 1e-37  ;;  %v1933_v1 = vpop.f32.mrb[13].mxu0 }
 0xdc2   :  { %2019 = vlog2.f32 %v1388_v0 }
 0xdcc   :  { %v2020_v6 = vpop.eup %2019 }
 0xdcd   :  { %v1392_v8 = vmul.f32 0.6931472, %v2020_v6  ;;  %v115_v6 = vpop.trf.xlu0 }
 0xdcf   :  { %v1393_v9 = vadd.f32 %v1392_v8, %v1390_v7  ;;  %v1688_v7 = vsel %vm1687_vm5, 1, %v2107_v14 }
 0xdd1   :  { %v1403_v10 = vsel %vm1402_vm15, %v1393_v9, %v1306_v53  ;;  %v1692_v9 = vrot.slane %v1688_v7, %v2194_v46 }
 0xdd2   :  { %v1406_v11 = vrot.slane %v1403_v10, 4 }
 0xdd3   :  { %vm1693_vm6 = vcmp.eq.s32.totalorder %v1692_v9, 1 }
 0xdd4   :  { %v1407_v13 = vmax.f32 %v1403_v10, %v1406_v11 }
 0xdd6   :  { %v1408_v15 = vrot.slane %v1407_v13, 2 }
 0xdd8   :  { %v1409_v16 = vmax.f32 %v1407_v13, %v1408_v15 }
 0xdda   :  { %v1410_v17 = vrot.slane %v1409_v16, 1 }
 0xddc   :  { %v1411_v18 = vmax.f32 %v1409_v16, %v1410_v17 }
 0xdde   :  { %v1412_v19 = vsub.f32 %v1403_v10, %v1411_v18  ;;  %v1486_v28 = vadd.f32 %v1411_v18, %v113_v26 }
 0xde0   :  { %v1413_v20 = vmul.f32 1.442695, %v1412_v19  ;;  %v1487_v31 = vadd.f32 %v1486_v28, %v2185_v41 }
 0xde2   :  { %2021 = vpow2.f32 %v1413_v20 }
 0xdec   :  { %v2022_v21 = vpop.eup %2021 }
 0xded   :  { %1935 = vmatpush3.msra.mxu1 %v2022_v21 }
 0xdee   :  { %1937 = vmatmul.mubr.msk.f32.vlgmr.msra.gmra.mrb[12].mxu1 %vm53_vm1, %v2178_v22  ;;  %1944 = vmatprep.subr.mxu1 %v2105_v12 }
 0xdef   :  { %1946 = vmatprep.mubr.msk.f32.mxu1 %vm2106_vm3, %v2105_v12  ;;  %vm1590_vm3 = vcmp.gt.s32.totalorder %v2190_v44, 14 }
 0xdf0   :  { %v1591_v50 = vsel %vm1590_vm3, 1, %v2107_v14 }
 0xdf1   :  { %v1595_v52 = vrot.slane %v1591_v50, %v2194_v46 }
 0xdf3   :  { %vm1596_vm4 = vcmp.eq.s32.totalorder %v1595_v52, 1 }
 0xec1   :  { %v1481_v23 = vpop.f32.mrb[12].mxu1 }
 0xec2   :  { %v1485_v24 = vmax.f32 %v1481_v23, 1e-37  ;;  %v1938_v25 = vpop.f32.mrb[13].mxu1 }
 0xec4   :  { %2023 = vlog2.f32 %v1485_v24 }
 0xece   :  { %v2024_v30 = vpop.eup %2023 }
 0xecf   :  { %v1489_v32 = vmul.f32 0.6931472, %v2024_v30 }
 0xed1   :  { %v1490_v33 = vadd.f32 %v1489_v32, %v1487_v31 }
 0xed3   :  { %v1500_v34 = vsel %vm1499_vm2, %v1490_v33, %v1403_v10 }
 0xed4   :  { %v1503_v12 = vrot.slane %v1500_v34, 4 }
 0xed6   :  { %v1504_v35 = vmax.f32 %v1500_v34, %v1503_v12 }
 0xed8   :  { %v1505_v36 = vrot.slane %v1504_v35, 2 }
 0xeda   :  { %v1506_v37 = vmax.f32 %v1504_v35, %v1505_v36 }
 0xedc   :  { %v1507_v38 = vrot.slane %v1506_v37, 1 }
 0xede   :  { %v1508_v39 = vmax.f32 %v1506_v37, %v1507_v38 }
 0xee0   :  { %v1509_v40 = vsub.f32 %v1500_v34, %v1508_v39  ;;  %v1583_v51 = vadd.f32 %v1508_v39, %v114_v49 }
 0xee2   :  { %v1510_v42 = vmul.f32 1.442695, %v1509_v40  ;;  %v1584_v54 = vadd.f32 %v1583_v51, %v2185_v41 }
 0xee4   :  { %2025 = vpow2.f32 %v1510_v42 }
 0xeee   :  { %v2026_v43 = vpop.eup %2025 }
 0xeef   :  { %1940 = vmatpush3.msra.mxu0 %v2026_v43 }
 0xef0   :  { %1942 = vmatmul.mubr.msk.f32.vlgmr.msra.gmra.mrb[14].mxu0 %vm53_vm1, %v2178_v22 }
 0xfc3   :  { %v1578_v45 = vpop.f32.mrb[14].mxu0 }
 0xfc4   :  { %v1582_v47 = vmax.f32 %v1578_v45, 1e-37  ;;  %v1943_v48 = vpop.f32.mrb[15].mxu0 }
 0xfc6   :  { %2027 = vlog2.f32 %v1582_v47 }
 0xfd0   :  { %v2028_v53 = vpop.eup %2027 }
 0xfd1   :  { %v1586_v55 = vmul.f32 0.6931472, %v2028_v53 }
 0xfd3   :  { %v1587_v56 = vadd.f32 %v1586_v55, %v1584_v54 }
 0xfd5   :  { %v1597_v57 = vsel %vm1596_vm4, %v1587_v56, %v1500_v34 }
 0xfd6   :  { %v1600_v58 = vrot.slane %v1597_v57, 4 }
 0xfd8   :  { %v1601_v59 = vmax.f32 %v1597_v57, %v1600_v58 }
 0xfda   :  { %v1602_v60 = vrot.slane %v1601_v59, 2 }
 0xfdc   :  { %v1603_v61 = vmax.f32 %v1601_v59, %v1602_v60 }
 0xfde   :  { %v1604_v62 = vrot.slane %v1603_v61, 1 }
 0xfe0   :  { %v1605_v63 = vmax.f32 %v1603_v61, %v1604_v62 }
 0xfe2   :  { %v1606_v0 = vsub.f32 %v1597_v57, %v1605_v63  ;;  %v1680_v8 = vadd.f32 %v1605_v63, %v115_v6 }
 0xfe4   :  { %v1607_v1 = vmul.f32 1.442695, %v1606_v0  ;;  %v1681_v11 = vadd.f32 %v1680_v8, %v2185_v41 }
 0xfe6   :  { %2029 = vpow2.f32 %v1607_v1 }
 0xff0   :  { %v2030_v2 = vpop.eup %2029 }
 0xff1   :  { %1945 = vmatpush3.msra.mxu1 %v2030_v2 }
 0xff2   :  { %1947 = vmatmul.mubr.msk.f32.vlgmr.msra.gmra.mrb[14].mxu1 %vm53_vm1, %v2178_v22 }
0x10c5   :  { %v1675_v3 = vpop.f32.mrb[14].mxu1 }
0x10c6   :  { %v1679_v4 = vmax.f32 %v1675_v3, 1e-37  ;;  %v1948_v5 = vpop.f32.mrb[15].mxu1 }
0x10c8   :  { %2031 = vlog2.f32 %v1679_v4 }
0x10d2   :  { %v2032_v10 = vpop.eup %2031 }
0x10d3   :  { %v1683_v13 = vmul.f32 0.6931472, %v2032_v10 }
0x10d5   :  { %v1684_v15 = vadd.f32 %v1683_v13, %v1681_v11 }
0x10d7   :  { %v1694_v16 = vsel %vm1693_vm6, %v1684_v15, %v1597_v57 }
0x10d8   :  { %1695 = vst [vmem:[#allocation2] sm:$0xff] %v1694_v16 }
0x10d9 PF:  { %v2108_v17 = vmov 0.0   ;;  %vm2109_vm7 = vmmov 0   ;;  %v1701_v44 = vld [vmem:[#allocation3 + $0x7] sm:$0x1]  ;;  %v2110_v14 = vmov 0   ;;  %s2111_s2 = smov [#allocation11]  }
0x10da   :  { %1949 = vmatprep.subr.mxu0 %v2108_v17  ;;  %1951 = vmatprep.mubr.msk.f32.mxu0 %vm2109_vm7, %v2108_v17  ;;  %s1802_s17 = sshll.u32 %s2111_s2, 4  ;;  %s1803_s17 = int_to_ptr.vmem [resolvable:$true] %s1802_s17 }
0x10db   :  { %2033 = vset.pattern.permute.xlu0 %v2110_v14  ;;  %s2072_s18 = scalar_lea.vmem %s1803_s17, 16  ;;  %s2076_s19 = scalar_lea.vmem %s1803_s17, 32 }
0x10dc   :  { %1788 = vperm.xlu0 %2033, %v1701_v44   ;;  %p2073_p3 = scmp.ne.s32.totalorder %s1803_s17, %s2072_s18  ;;  %p2077_p4 = scmp.lt.s32.totalorder %s1803_s17, %s1803_s17 }
0x10dd   :  { %p2078_p5 = scmp.lt.s32.totalorder %s2076_s19, %s2072_s18 }
0x10df   :  { %v1699_v22 = vld [vmem:[#allocation2] sm:$0xff]  ;;  %v1700_v25 = vld [vmem:[#allocation4 + $0x7] sm:$0x1]  ;;  %p2079_p6 = por %p2078_p5, %p2077_p4 }
0x10e0   :  { %v1702_v18 = vrot.slane %v1699_v22, 4 }
0x10e1   :  { %p2080_p7 = pnand %p2079_p6, %p2073_p3 }
0x10e2   :  { %v1703_v19 = vmax.f32 %v1699_v22, %v1702_v18 }
0x10e4   :  { %v1704_v46 = vrot.slane %v1703_v19, 2 }
0x10e6   :  { %v1705_v20 = vmax.f32 %v1703_v19, %v1704_v46 }
0x10e8   :  { %v1706_v41 = vrot.slane %v1705_v20, 1 }
0x10ea   :  { %v1707_v21 = vmax.f32 %v1705_v20, %v1706_v41 }
0x10ec   :  { %v1708_v23 = vsub.f32 %v1699_v22, %v1707_v21 }
0x10ee   :  { %v1709_v24 = vmul.f32 1.442695, %v1708_v23 }
0x10f0   :  { %2034 = vpow2.f32 %v1709_v24 }
0x10fa   :  { %v2035_v26 = vpop.eup %2034 }
0x10fb   :  { %1950 = vmatpush3.msra.mxu0 %v2035_v26 }
0x10fc   :  { %1952 = vmatmul.mubr.msk.f32.vlgmr.msra.gmra.mrb[0].mxu0 %vm53_vm1, %v1700_v25 }
0x115b   :  { %v1789_v30 = vpop.permute.xlu0 %1788 }
0x115c   :  { %v1791_v31 = vadd.f32 %v1789_v30, %v1707_v21 }
0x11cf   :  { %v1781_v27 = vpop.f32.mrb[0].mxu0 }
0x11d0   :  { %v1785_v28 = vmax.f32 %v1781_v27, 1e-37  ;;  %v1953_v29 = vpop.f32.mrb[1].mxu0 }
0x11d2   :  { %2036 = vlog2.f32 %v1785_v28 }
0x11dc   :  { %v2037_v32 = vpop.eup %2036 }
0x11dd   :  { %v1793_v33 = vmul.f32 0.6931472, %v2037_v32 }
0x11df   :  { %v1794_v34 = vadd.f32 %v1793_v33, %v1791_v31 }
0x11e1   :  { %1795 = vst [vmem:[#allocation11] sm:$0x1] %v1794_v34 }
0x11e2   :  { %2083 = shalt.err (!%p2080_p7)
}
0x11e3   :  { %s2084_s22 = scalar_lea.hbm %s2346_s4, 16 }
0x11e4   :  { %p2085_p8 = scmp.ne.s32.totalorder %s2346_s4, %s2084_s22  ;;  %p2088_p9 = scmp.lt.u32.totalorder %s2084_s22, %s2346_s4 }
0x11e6   :  { %p2090_p10 = pnand %p2088_p9, %p2085_p8 }
0x11e8   :  { %2093 = shalt.err (!%p2090_p10)
}
0x11e9   :  { %1805 = dma.vmem_to_hbm [thread:$0]  %s1803_s17, 16, %s2346_s4, [#allocation10]  }
0x11ea   :  { %2098 = dma.done.wait [#allocation10], 16  }
0x11eb   :  { %2099 = vsyncadd [#allocation10], 4294967280 }
0x11ec   :  { %1809 = vsyncpa [#allocation9], 1 }
0x11ed   :  { %1810 = vsyncpa [#allocation10], 1 }

</bundles_post_ra>
